<compile_context>
chip_gen: v6e
topology: v6e:2x2x1
jax: 0.10.0
libtpu: 0.0.40
codegen_flags: <defaults>
</compile_context>

<pallas_src>
import functools

import jax
import jax.numpy as jnp
from jax.experimental import pallas as pl
from jax.experimental.pallas import tpu as pltpu


def _inception_dw_kernel(x_ref, w_ref, b_ref, out_ref, *, H, W, offsets, n_copy_rows):
    """One grid step = the tail (B, H*W) channel block of one sample.

    Rows [0, n_copy_rows)            : identity channels (weight table has a single
                                       1.0 at the (0,0) tap, bias 0, no ReLU).
    Rows [n_copy_rows, B)            : the three depthwise-conv branches, evaluated
                                       with a unified tap table + folded BN + ReLU.
    """
    HW = H * W
    B = x_ref.shape[0]

    x = x_ref[...].astype(jnp.float32)        # (B, HW), lane-dense
    w = w_ref[...].astype(jnp.float32)        # (B, n_taps) unified tap table
    bias = b_ref[...].astype(jnp.float32)     # (B, 1) folded BN bias

    # Per-lane coordinates for in-kernel zero padding (no extra inputs / DMAs).
    lane = jax.lax.broadcasted_iota(jnp.int32, (1, HW), 1)
    if (W & (W - 1)) == 0:
        wc = jnp.bitwise_and(lane, W - 1)     # column index (power-of-two W)
    else:
        wc = lane % W                         # TODO(synk): generic-W fallback

    acc = jnp.zeros_like(x)
    for t, (oh, ow) in enumerate(offsets):
        s = oh * W + ow
        # xs[p] = x[p + s]  (single XLU lane rotation per tap).
        xs = x if s == 0 else pltpu.roll(x, shift=(-s) % HW, axis=1)
        # In-kernel zero padding: mask out-of-image taps (also kills row wrap).
        conds = []
        if oh > 0:
            conds.append(lane < (H - oh) * W)     # hc <  H - oh
        elif oh < 0:
            conds.append(lane >= (-oh) * W)       # hc >= -oh
        if ow > 0:
            conds.append(wc < (W - ow))
        elif ow < 0:
            conds.append(wc >= (-ow))
        if conds:
            valid = conds[0]
            for c in conds[1:]:
                valid = jnp.logical_and(valid, c)
            xs = jnp.where(valid, xs, 0.0)
        acc = acc + xs * w[:, t:t + 1]            # per-channel weight, lane-broadcast

    y = acc + bias
    # ReLU only on the conv rows; the leading identity rows pass through exactly.
    row = jax.lax.broadcasted_iota(jnp.int32, (B, 1), 0)
    y = jnp.where(row >= n_copy_rows, jnp.maximum(y, 0.0), y)

    # Single full-width, unmasked store of the whole block.
    out_ref[...] = y.astype(out_ref.dtype)


def _fold_bn(w, bn, eps=1e-5):
    """Fold eval-mode BatchNorm into per-channel depthwise conv weight + bias."""
    gamma, beta, mean, var = bn
    scale = gamma / jnp.sqrt(var + eps)          # (gc,)
    w_f = w * scale[:, None, None]               # (gc, kh, kw)
    b_f = beta - mean * scale                    # (gc,)
    return w_f, b_f


def inception_dwconv2d(x_nchw, params, *, square_kernel_size=3,
                       band_kernel_size=11, branch_ratio=0.125):
    N, C, H, W = x_nchw.shape
    gc = int(C * branch_ratio)
    c_id = C - 3 * gc
    assert gc > 0 and c_id >= 0, "invalid channel split"
    HW = H * W

    # Channel block: smallest divisor of C that covers all 3*gc conv channels,
    # preferring a multiple of 8 sublane rows (f32 tile rule; also covers bf16=16 here).
    conv_span = 3 * gc
    cands = [b for b in range(conv_span, C + 1) if C % b == 0]
    B = next((b for b in cands if b % 8 == 0), cands[0])
    extra = B - conv_span                # leading identity rows carried for alignment
    c_blk_idx = C // B - 1               # the block sits at the tail of the channel axis

    sp = square_kernel_size // 2
    bp = band_kernel_size // 2

    # Fold BN (eval) into conv weights / biases.
    w_sq, b_sq = _fold_bn(params['w_hw'], params['bn_hw'])   # (gc,3,3), (gc,)
    w_w, b_w = _fold_bn(params['w_w'], params['bn_w'])       # (gc,1,11)
    w_h, b_h = _fold_bn(params['w_h'], params['bn_h'])       # (gc,11,1)

    # Union of tap offsets over the three branches (25 taps for the defaults).
    offsets = []
    for dh in range(square_kernel_size):
        for dw in range(square_kernel_size):
            offsets.append((dh - sp, dw - sp))
    for dw in range(band_kernel_size):
        o = (0, dw - bp)
        if o not in offsets:
            offsets.append(o)
    for dh in range(band_kernel_size):
        o = (dh - bp, 0)
        if o not in offsets:
            offsets.append(o)
    n_taps = len(offsets)

    # Unified (B, n_taps) weight table + (B, 1) bias; identity rows = 1.0 at (0,0).
    w_tab = jnp.zeros((B, n_taps), jnp.float32)
    b_tab = jnp.zeros((B, 1), jnp.float32)
    if extra > 0:
        w_tab = w_tab.at[:extra, offsets.index((0, 0))].set(1.0)
    for dh in range(square_kernel_size):
        for dw in range(square_kernel_size):
            t = offsets.index((dh - sp, dw - sp))
            w_tab = w_tab.at[extra:extra + gc, t].set(w_sq[:, dh, dw])
    for dw in range(band_kernel_size):
        t = offsets.index((0, dw - bp))
        w_tab = w_tab.at[extra + gc:extra + 2 * gc, t].set(w_w[:, 0, dw])
    for dh in range(band_kernel_size):
        t = offsets.index((dh - bp, 0))
        w_tab = w_tab.at[extra + 2 * gc:extra + 3 * gc, t].set(w_h[:, dh, 0])
    b_tab = b_tab.at[extra:extra + gc, 0].set(b_sq)
    b_tab = b_tab.at[extra + gc:extra + 2 * gc, 0].set(b_w)
    b_tab = b_tab.at[extra + 2 * gc:, 0].set(b_h)

    # Free, contiguous reshape: NCHW -> (N, C, H*W).  No transpose / pad / split passes.
    x_flat = x_nchw.reshape(N, C, HW)

    kern = functools.partial(_inception_dw_kernel, H=H, W=W,
                             offsets=tuple(offsets), n_copy_rows=extra)

    blk_bytes = B * HW * x_flat.dtype.itemsize
    vmem_limit = int(min(64 * 2**20, max(16 * 2**20, 8 * blk_bytes)))

    out_flat = pl.pallas_call(
        kern,
        out_shape=jax.ShapeDtypeStruct((N, C, HW), x_flat.dtype),
        grid=(N,),
        in_specs=[
            pl.BlockSpec((None, B, HW), lambda n: (n, c_blk_idx, 0)),
            pl.BlockSpec((B, n_taps), lambda n: (0, 0)),
            pl.BlockSpec((B, 1), lambda n: (0, 0)),
        ],
        out_specs=pl.BlockSpec((None, B, HW), lambda n: (n, c_blk_idx, 0)),
        # Output aliases the input: channels outside the tail block are never
        # read or written by the kernel -- they pass through untouched in HBM.
        input_output_aliases={0: 0},
        compiler_params=pltpu.CompilerParams(
            dimension_semantics=("parallel",),
            vmem_limit_bytes=vmem_limit),
    )(x_flat, w_tab, b_tab)

    # Free reshape back; output stays NCHW like the PyTorch module.
    return out_flat.reshape(N, C, H, W)


def _reference_forward(x_nchw, params, *, square_kernel_size=3,
                       band_kernel_size=11, branch_ratio=0.125, eps=1e-5):
    """Pure-JAX reference (lax depthwise conv + BN eval + ReLU)."""
    N, C, H, W = x_nchw.shape
    gc = int(C * branch_ratio)
    c_id = C - 3 * gc

    x_id = x_nchw[:, :c_id]
    x_hw = x_nchw[:, c_id:c_id + gc]
    x_w = x_nchw[:, c_id + gc:c_id + 2 * gc]
    x_h = x_nchw[:, c_id + 2 * gc:]

    def branch(xb, w, bn, pad):
        y = jax.lax.conv_general_dilated(
            xb, w[:, None, :, :], window_strides=(1, 1), padding=pad,
            dimension_numbers=('NCHW', 'OIHW', 'NCHW'),
            feature_group_count=gc)
        gamma, beta, mean, var = bn
        y = (y - mean[None, :, None, None]) / jnp.sqrt(var[None, :, None, None] + eps)
        y = y * gamma[None, :, None, None] + beta[None, :, None, None]
        return jnp.maximum(y, 0.0)

    sp = square_kernel_size // 2
    bp = band_kernel_size // 2
    y_hw = branch(x_hw, params['w_hw'], params['bn_hw'], ((sp, sp), (sp, sp)))
    y_w = branch(x_w, params['w_w'], params['bn_w'], ((0, 0), (bp, bp)))
    y_h = branch(x_h, params['w_h'], params['bn_h'], ((bp, bp), (0, 0)))
    return jnp.concatenate((x_id, y_hw, y_w, y_h), axis=1)


def _init_params(key, gc, square_k=3, band_k=11):
    ks = jax.random.split(key, 12)

    def bn(k0, k1, k2, k3):
        gamma = jax.random.uniform(k0, (gc,), jnp.float32, 0.5, 1.5)
        beta = 0.1 * jax.random.normal(k1, (gc,), jnp.float32)
        mean = 0.1 * jax.random.normal(k2, (gc,), jnp.float32)
        var = jax.random.uniform(k3, (gc,), jnp.float32, 0.5, 1.5)
        return (gamma, beta, mean, var)

    return {
        'w_hw': 0.3 * jax.random.normal(ks[0], (gc, square_k, square_k), jnp.float32),
        'bn_hw': bn(ks[1], ks[2], ks[3], ks[4]),
        'w_w': 0.3 * jax.random.normal(ks[5], (gc, 1, band_k), jnp.float32),
        'bn_w': bn(ks[6], ks[7], ks[8], ks[9]),
        'w_h': 0.3 * jax.random.normal(ks[10], (gc, band_k, 1), jnp.float32),
        'bn_h': bn(ks[11], ks[1], ks[5], ks[0]),
    }


if __name__ == "__main__":
    import warnings
    warnings.filterwarnings("ignore", message=".*donated.*")  # donation is best-effort

    key = jax.random.PRNGKey(0)
    kx, kp = jax.random.split(key)

    N, C, H, W = 2, 32, 16, 16          # gc = 4, channel split = (20, 4, 4, 4)
    gc = int(C * 0.125)

    x = jax.random.normal(kx, (N, C, H, W), jnp.float32)
    params = _init_params(kp, gc)

    # Reference first (uses x before it is donated to the kernel).
    ref = jax.block_until_ready(_reference_forward(x, params))

    # Donate x so input_output_aliases really aliases and the identity channels
    # never touch HBM again.
    fwd = jax.jit(inception_dwconv2d, donate_argnums=(0,))
    out = jax.block_until_ready(fwd(x, params))

    assert out.shape == (N, C, H, W)
    max_err = jnp.max(jnp.abs(out - ref))
    assert jnp.allclose(out, ref, atol=1e-4, rtol=1e-4), f"max abs err {max_err}"

    print("KERNEL_OK")
</pallas_src>

<mosaic_0001>
module attributes {stable_mosaic.version = 11 : i64} {
  func.func @_inception_dw_kernel(%arg0: i32, %arg1: memref<1x16x256xf32, #tpu.memory_space<vmem>>, %arg2: memref<16x25xf32, #tpu.memory_space<vmem>>, %arg3: memref<16x1xf32, #tpu.memory_space<vmem>>, %arg4: memref<1x16x256xf32, #tpu.memory_space<vmem>>) attributes {dimension_semantics = [#tpu.dimension_semantics<parallel>], iteration_bounds = array<i64: 2>, scalar_prefetch = 0 : i64, scratch_operands = 0 : i64, tpu.core_type = #tpu.core_type<tc>, window_params = [{transform_indices = @transform_0, window_bounds = array<i64: 1, 16, 256>}, {pipeline_mode = #tpu.pipeline_mode<synchronous>, transform_indices = @transform_1, window_bounds = array<i64: 16, 25>}, {pipeline_mode = #tpu.pipeline_mode<synchronous>, transform_indices = @transform_2, window_bounds = array<i64: 16, 1>}, {transform_indices = @transform_3, window_bounds = array<i64: 1, 16, 256>}]} {
    %c0 = arith.constant 0 : index
    %c0_0 = arith.constant 0 : index
    %c0_1 = arith.constant 0 : index
    %0 = vector.load %arg1[%c0, %c0_0, %c0_1] : memref<1x16x256xf32, #tpu.memory_space<vmem>>, vector<1x16x256xf32>
    %1 = vector.shape_cast %0 : vector<1x16x256xf32> to vector<16x256xf32>
    %c0_2 = arith.constant 0 : index
    %c0_3 = arith.constant 0 : index
    %2 = vector.load %arg2[%c0_2, %c0_3] : memref<16x25xf32, #tpu.memory_space<vmem>>, vector<16x25xf32>
    %c0_4 = arith.constant 0 : index
    %c0_5 = arith.constant 0 : index
    %3 = vector.load %arg3[%c0_4, %c0_5] : memref<16x1xf32, #tpu.memory_space<vmem>>, vector<16x1xf32>
    %4 = tpu.iota {dimensions = array<i32: 1>} : vector<1x256xi32>
    %c15_i32 = arith.constant 15 : i32
    %5 = vector.broadcast %c15_i32 : i32 to vector<1x256xi32>
    %6 = arith.andi %4, %5 : vector<1x256xi32>
    %cst = arith.constant 0.000000e+00 : f32
    %7 = vector.broadcast %cst : f32 to vector<16x256xf32>
    %c17_i32 = arith.constant 17 : i32
    %8 = tpu.dynamic_rotate %1 by %c17_i32 dim 1 : vector<16x256xf32>, i32 -> vector<16x256xf32>
    %c16_i32 = arith.constant 16 : i32
    %9 = vector.broadcast %c16_i32 : i32 to vector<1x256xi32>
    %10 = arith.cmpi sge, %4, %9 : vector<1x256xi32>
    %c1_i32 = arith.constant 1 : i32
    %11 = vector.broadcast %c1_i32 : i32 to vector<1x256xi32>
    %12 = arith.cmpi sge, %6, %11 : vector<1x256xi32>
    %13 = arith.andi %10, %12 : vector<1x256xi1>
    %cst_6 = arith.constant 0.000000e+00 : f32
    %14 = vector.shape_cast %13 : vector<1x256xi1> to vector<1x256xi1>
    %15 = vector.broadcast %14 : vector<1x256xi1> to vector<16x256xi1>
    %16 = vector.broadcast %cst_6 : f32 to vector<16x256xf32>
    %17 = arith.select %15, %8, %16 : vector<16x256xi1>, vector<16x256xf32>
    %18 = vector.extract_strided_slice %2 {offsets = [0, 0], sizes = [16, 1], strides = [1, 1]} : vector<16x25xf32> to vector<16x1xf32>
    %19 = vector.broadcast %18 : vector<16x1xf32> to vector<16x256xf32>
    %20 = arith.mulf %17, %19 : vector<16x256xf32>
    %21 = arith.addf %7, %20 : vector<16x256xf32>
    %c16_i32_7 = arith.constant 16 : i32
    %22 = tpu.dynamic_rotate %1 by %c16_i32_7 dim 1 : vector<16x256xf32>, i32 -> vector<16x256xf32>
    %c16_i32_8 = arith.constant 16 : i32
    %23 = vector.broadcast %c16_i32_8 : i32 to vector<1x256xi32>
    %24 = arith.cmpi sge, %4, %23 : vector<1x256xi32>
    %cst_9 = arith.constant 0.000000e+00 : f32
    %25 = vector.shape_cast %24 : vector<1x256xi1> to vector<1x256xi1>
    %26 = vector.broadcast %25 : vector<1x256xi1> to vector<16x256xi1>
    %27 = vector.broadcast %cst_9 : f32 to vector<16x256xf32>
    %28 = arith.select %26, %22, %27 : vector<16x256xi1>, vector<16x256xf32>
    %29 = vector.extract_strided_slice %2 {offsets = [0, 1], sizes = [16, 1], strides = [1, 1]} : vector<16x25xf32> to vector<16x1xf32>
    %30 = vector.broadcast %29 : vector<16x1xf32> to vector<16x256xf32>
    %31 = arith.mulf %28, %30 : vector<16x256xf32>
    %32 = arith.addf %21, %31 : vector<16x256xf32>
    %c15_i32_10 = arith.constant 15 : i32
    %33 = tpu.dynamic_rotate %1 by %c15_i32_10 dim 1 : vector<16x256xf32>, i32 -> vector<16x256xf32>
    %c16_i32_11 = arith.constant 16 : i32
    %34 = vector.broadcast %c16_i32_11 : i32 to vector<1x256xi32>
    %35 = arith.cmpi sge, %4, %34 : vector<1x256xi32>
    %c15_i32_12 = arith.constant 15 : i32
    %36 = vector.broadcast %c15_i32_12 : i32 to vector<1x256xi32>
    %37 = arith.cmpi slt, %6, %36 : vector<1x256xi32>
    %38 = arith.andi %35, %37 : vector<1x256xi1>
    %cst_13 = arith.constant 0.000000e+00 : f32
    %39 = vector.shape_cast %38 : vector<1x256xi1> to vector<1x256xi1>
    %40 = vector.broadcast %39 : vector<1x256xi1> to vector<16x256xi1>
    %41 = vector.broadcast %cst_13 : f32 to vector<16x256xf32>
    %42 = arith.select %40, %33, %41 : vector<16x256xi1>, vector<16x256xf32>
    %43 = vector.extract_strided_slice %2 {offsets = [0, 2], sizes = [16, 1], strides = [1, 1]} : vector<16x25xf32> to vector<16x1xf32>
    %44 = vector.broadcast %43 : vector<16x1xf32> to vector<16x256xf32>
    %45 = arith.mulf %42, %44 : vector<16x256xf32>
    %46 = arith.addf %32, %45 : vector<16x256xf32>
    %c1_i32_14 = arith.constant 1 : i32
    %47 = tpu.dynamic_rotate %1 by %c1_i32_14 dim 1 : vector<16x256xf32>, i32 -> vector<16x256xf32>
    %c1_i32_15 = arith.constant 1 : i32
    %48 = vector.broadcast %c1_i32_15 : i32 to vector<1x256xi32>
    %49 = arith.cmpi sge, %6, %48 : vector<1x256xi32>
    %cst_16 = arith.constant 0.000000e+00 : f32
    %50 = vector.shape_cast %49 : vector<1x256xi1> to vector<1x256xi1>
    %51 = vector.broadcast %50 : vector<1x256xi1> to vector<16x256xi1>
    %52 = vector.broadcast %cst_16 : f32 to vector<16x256xf32>
    %53 = arith.select %51, %47, %52 : vector<16x256xi1>, vector<16x256xf32>
    %54 = vector.extract_strided_slice %2 {offsets = [0, 3], sizes = [16, 1], strides = [1, 1]} : vector<16x25xf32> to vector<16x1xf32>
    %55 = vector.broadcast %54 : vector<16x1xf32> to vector<16x256xf32>
    %56 = arith.mulf %53, %55 : vector<16x256xf32>
    %57 = arith.addf %46, %56 : vector<16x256xf32>
    %58 = vector.extract_strided_slice %2 {offsets = [0, 4], sizes = [16, 1], strides = [1, 1]} : vector<16x25xf32> to vector<16x1xf32>
    %59 = vector.broadcast %58 : vector<16x1xf32> to vector<16x256xf32>
    %60 = arith.mulf %1, %59 : vector<16x256xf32>
    %61 = arith.addf %57, %60 : vector<16x256xf32>
    %c255_i32 = arith.constant 255 : i32
    %62 = tpu.dynamic_rotate %1 by %c255_i32 dim 1 : vector<16x256xf32>, i32 -> vector<16x256xf32>
    %c15_i32_17 = arith.constant 15 : i32
    %63 = vector.broadcast %c15_i32_17 : i32 to vector<1x256xi32>
    %64 = arith.cmpi slt, %6, %63 : vector<1x256xi32>
    %cst_18 = arith.constant 0.000000e+00 : f32
    %65 = vector.shape_cast %64 : vector<1x256xi1> to vector<1x256xi1>
    %66 = vector.broadcast %65 : vector<1x256xi1> to vector<16x256xi1>
    %67 = vector.broadcast %cst_18 : f32 to vector<16x256xf32>
    %68 = arith.select %66, %62, %67 : vector<16x256xi1>, vector<16x256xf32>
    %69 = vector.extract_strided_slice %2 {offsets = [0, 5], sizes = [16, 1], strides = [1, 1]} : vector<16x25xf32> to vector<16x1xf32>
    %70 = vector.broadcast %69 : vector<16x1xf32> to vector<16x256xf32>
    %71 = arith.mulf %68, %70 : vector<16x256xf32>
    %72 = arith.addf %61, %71 : vector<16x256xf32>
    %c241_i32 = arith.constant 241 : i32
    %73 = tpu.dynamic_rotate %1 by %c241_i32 dim 1 : vector<16x256xf32>, i32 -> vector<16x256xf32>
    %c240_i32 = arith.constant 240 : i32
    %74 = vector.broadcast %c240_i32 : i32 to vector<1x256xi32>
    %75 = arith.cmpi slt, %4, %74 : vector<1x256xi32>
    %c1_i32_19 = arith.constant 1 : i32
    %76 = vector.broadcast %c1_i32_19 : i32 to vector<1x256xi32>
    %77 = arith.cmpi sge, %6, %76 : vector<1x256xi32>
    %78 = arith.andi %75, %77 : vector<1x256xi1>
    %cst_20 = arith.constant 0.000000e+00 : f32
    %79 = vector.shape_cast %78 : vector<1x256xi1> to vector<1x256xi1>
    %80 = vector.broadcast %79 : vector<1x256xi1> to vector<16x256xi1>
    %81 = vector.broadcast %cst_20 : f32 to vector<16x256xf32>
    %82 = arith.select %80, %73, %81 : vector<16x256xi1>, vector<16x256xf32>
    %83 = vector.extract_strided_slice %2 {offsets = [0, 6], sizes = [16, 1], strides = [1, 1]} : vector<16x25xf32> to vector<16x1xf32>
    %84 = vector.broadcast %83 : vector<16x1xf32> to vector<16x256xf32>
    %85 = arith.mulf %82, %84 : vector<16x256xf32>
    %86 = arith.addf %72, %85 : vector<16x256xf32>
    %c240_i32_21 = arith.constant 240 : i32
    %87 = tpu.dynamic_rotate %1 by %c240_i32_21 dim 1 : vector<16x256xf32>, i32 -> vector<16x256xf32>
    %c240_i32_22 = arith.constant 240 : i32
    %88 = vector.broadcast %c240_i32_22 : i32 to vector<1x256xi32>
    %89 = arith.cmpi slt, %4, %88 : vector<1x256xi32>
    %cst_23 = arith.constant 0.000000e+00 : f32
    %90 = vector.shape_cast %89 : vector<1x256xi1> to vector<1x256xi1>
    %91 = vector.broadcast %90 : vector<1x256xi1> to vector<16x256xi1>
    %92 = vector.broadcast %cst_23 : f32 to vector<16x256xf32>
    %93 = arith.select %91, %87, %92 : vector<16x256xi1>, vector<16x256xf32>
    %94 = vector.extract_strided_slice %2 {offsets = [0, 7], sizes = [16, 1], strides = [1, 1]} : vector<16x25xf32> to vector<16x1xf32>
    %95 = vector.broadcast %94 : vector<16x1xf32> to vector<16x256xf32>
    %96 = arith.mulf %93, %95 : vector<16x256xf32>
    %97 = arith.addf %86, %96 : vector<16x256xf32>
    %c239_i32 = arith.constant 239 : i32
    %98 = tpu.dynamic_rotate %1 by %c239_i32 dim 1 : vector<16x256xf32>, i32 -> vector<16x256xf32>
    %c240_i32_24 = arith.constant 240 : i32
    %99 = vector.broadcast %c240_i32_24 : i32 to vector<1x256xi32>
    %100 = arith.cmpi slt, %4, %99 : vector<1x256xi32>
    %c15_i32_25 = arith.constant 15 : i32
    %101 = vector.broadcast %c15_i32_25 : i32 to vector<1x256xi32>
    %102 = arith.cmpi slt, %6, %101 : vector<1x256xi32>
    %103 = arith.andi %100, %102 : vector<1x256xi1>
    %cst_26 = arith.constant 0.000000e+00 : f32
    %104 = vector.shape_cast %103 : vector<1x256xi1> to vector<1x256xi1>
    %105 = vector.broadcast %104 : vector<1x256xi1> to vector<16x256xi1>
    %106 = vector.broadcast %cst_26 : f32 to vector<16x256xf32>
    %107 = arith.select %105, %98, %106 : vector<16x256xi1>, vector<16x256xf32>
    %108 = vector.extract_strided_slice %2 {offsets = [0, 8], sizes = [16, 1], strides = [1, 1]} : vector<16x25xf32> to vector<16x1xf32>
    %109 = vector.broadcast %108 : vector<16x1xf32> to vector<16x256xf32>
    %110 = arith.mulf %107, %109 : vector<16x256xf32>
    %111 = arith.addf %97, %110 : vector<16x256xf32>
    %c5_i32 = arith.constant 5 : i32
    %112 = tpu.dynamic_rotate %1 by %c5_i32 dim 1 : vector<16x256xf32>, i32 -> vector<16x256xf32>
    %c5_i32_27 = arith.constant 5 : i32
    %113 = vector.broadcast %c5_i32_27 : i32 to vector<1x256xi32>
    %114 = arith.cmpi sge, %6, %113 : vector<1x256xi32>
    %cst_28 = arith.constant 0.000000e+00 : f32
    %115 = vector.shape_cast %114 : vector<1x256xi1> to vector<1x256xi1>
    %116 = vector.broadcast %115 : vector<1x256xi1> to vector<16x256xi1>
    %117 = vector.broadcast %cst_28 : f32 to vector<16x256xf32>
    %118 = arith.select %116, %112, %117 : vector<16x256xi1>, vector<16x256xf32>
    %119 = vector.extract_strided_slice %2 {offsets = [0, 9], sizes = [16, 1], strides = [1, 1]} : vector<16x25xf32> to vector<16x1xf32>
    %120 = vector.broadcast %119 : vector<16x1xf32> to vector<16x256xf32>
    %121 = arith.mulf %118, %120 : vector<16x256xf32>
    %122 = arith.addf %111, %121 : vector<16x256xf32>
    %c4_i32 = arith.constant 4 : i32
    %123 = tpu.dynamic_rotate %1 by %c4_i32 dim 1 : vector<16x256xf32>, i32 -> vector<16x256xf32>
    %c4_i32_29 = arith.constant 4 : i32
    %124 = vector.broadcast %c4_i32_29 : i32 to vector<1x256xi32>
    %125 = arith.cmpi sge, %6, %124 : vector<1x256xi32>
    %cst_30 = arith.constant 0.000000e+00 : f32
    %126 = vector.shape_cast %125 : vector<1x256xi1> to vector<1x256xi1>
    %127 = vector.broadcast %126 : vector<1x256xi1> to vector<16x256xi1>
    %128 = vector.broadcast %cst_30 : f32 to vector<16x256xf32>
    %129 = arith.select %127, %123, %128 : vector<16x256xi1>, vector<16x256xf32>
    %130 = vector.extract_strided_slice %2 {offsets = [0, 10], sizes = [16, 1], strides = [1, 1]} : vector<16x25xf32> to vector<16x1xf32>
    %131 = vector.broadcast %130 : vector<16x1xf32> to vector<16x256xf32>
    %132 = arith.mulf %129, %131 : vector<16x256xf32>
    %133 = arith.addf %122, %132 : vector<16x256xf32>
    %c3_i32 = arith.constant 3 : i32
    %134 = tpu.dynamic_rotate %1 by %c3_i32 dim 1 : vector<16x256xf32>, i32 -> vector<16x256xf32>
    %c3_i32_31 = arith.constant 3 : i32
    %135 = vector.broadcast %c3_i32_31 : i32 to vector<1x256xi32>
    %136 = arith.cmpi sge, %6, %135 : vector<1x256xi32>
    %cst_32 = arith.constant 0.000000e+00 : f32
    %137 = vector.shape_cast %136 : vector<1x256xi1> to vector<1x256xi1>
    %138 = vector.broadcast %137 : vector<1x256xi1> to vector<16x256xi1>
    %139 = vector.broadcast %cst_32 : f32 to vector<16x256xf32>
    %140 = arith.select %138, %134, %139 : vector<16x256xi1>, vector<16x256xf32>
    %141 = vector.extract_strided_slice %2 {offsets = [0, 11], sizes = [16, 1], strides = [1, 1]} : vector<16x25xf32> to vector<16x1xf32>
    %142 = vector.broadcast %141 : vector<16x1xf32> to vector<16x256xf32>
    %143 = arith.mulf %140, %142 : vector<16x256xf32>
    %144 = arith.addf %133, %143 : vector<16x256xf32>
    %c2_i32 = arith.constant 2 : i32
    %145 = tpu.dynamic_rotate %1 by %c2_i32 dim 1 : vector<16x256xf32>, i32 -> vector<16x256xf32>
    %c2_i32_33 = arith.constant 2 : i32
    %146 = vector.broadcast %c2_i32_33 : i32 to vector<1x256xi32>
    %147 = arith.cmpi sge, %6, %146 : vector<1x256xi32>
    %cst_34 = arith.constant 0.000000e+00 : f32
    %148 = vector.shape_cast %147 : vector<1x256xi1> to vector<1x256xi1>
    %149 = vector.broadcast %148 : vector<1x256xi1> to vector<16x256xi1>
    %150 = vector.broadcast %cst_34 : f32 to vector<16x256xf32>
    %151 = arith.select %149, %145, %150 : vector<16x256xi1>, vector<16x256xf32>
    %152 = vector.extract_strided_slice %2 {offsets = [0, 12], sizes = [16, 1], strides = [1, 1]} : vector<16x25xf32> to vector<16x1xf32>
    %153 = vector.broadcast %152 : vector<16x1xf32> to vector<16x256xf32>
    %154 = arith.mulf %151, %153 : vector<16x256xf32>
    %155 = arith.addf %144, %154 : vector<16x256xf32>
    %c254_i32 = arith.constant 254 : i32
    %156 = tpu.dynamic_rotate %1 by %c254_i32 dim 1 : vector<16x256xf32>, i32 -> vector<16x256xf32>
    %c14_i32 = arith.constant 14 : i32
    %157 = vector.broadcast %c14_i32 : i32 to vector<1x256xi32>
    %158 = arith.cmpi slt, %6, %157 : vector<1x256xi32>
    %cst_35 = arith.constant 0.000000e+00 : f32
    %159 = vector.shape_cast %158 : vector<1x256xi1> to vector<1x256xi1>
    %160 = vector.broadcast %159 : vector<1x256xi1> to vector<16x256xi1>
    %161 = vector.broadcast %cst_35 : f32 to vector<16x256xf32>
    %162 = arith.select %160, %156, %161 : vector<16x256xi1>, vector<16x256xf32>
    %163 = vector.extract_strided_slice %2 {offsets = [0, 13], sizes = [16, 1], strides = [1, 1]} : vector<16x25xf32> to vector<16x1xf32>
    %164 = vector.broadcast %163 : vector<16x1xf32> to vector<16x256xf32>
    %165 = arith.mulf %162, %164 : vector<16x256xf32>
    %166 = arith.addf %155, %165 : vector<16x256xf32>
    %c253_i32 = arith.constant 253 : i32
    %167 = tpu.dynamic_rotate %1 by %c253_i32 dim 1 : vector<16x256xf32>, i32 -> vector<16x256xf32>
    %c13_i32 = arith.constant 13 : i32
    %168 = vector.broadcast %c13_i32 : i32 to vector<1x256xi32>
    %169 = arith.cmpi slt, %6, %168 : vector<1x256xi32>
    %cst_36 = arith.constant 0.000000e+00 : f32
    %170 = vector.shape_cast %169 : vector<1x256xi1> to vector<1x256xi1>
    %171 = vector.broadcast %170 : vector<1x256xi1> to vector<16x256xi1>
    %172 = vector.broadcast %cst_36 : f32 to vector<16x256xf32>
    %173 = arith.select %171, %167, %172 : vector<16x256xi1>, vector<16x256xf32>
    %174 = vector.extract_strided_slice %2 {offsets = [0, 14], sizes = [16, 1], strides = [1, 1]} : vector<16x25xf32> to vector<16x1xf32>
    %175 = vector.broadcast %174 : vector<16x1xf32> to vector<16x256xf32>
    %176 = arith.mulf %173, %175 : vector<16x256xf32>
    %177 = arith.addf %166, %176 : vector<16x256xf32>
    %c252_i32 = arith.constant 252 : i32
    %178 = tpu.dynamic_rotate %1 by %c252_i32 dim 1 : vector<16x256xf32>, i32 -> vector<16x256xf32>
    %c12_i32 = arith.constant 12 : i32
    %179 = vector.broadcast %c12_i32 : i32 to vector<1x256xi32>
    %180 = arith.cmpi slt, %6, %179 : vector<1x256xi32>
    %cst_37 = arith.constant 0.000000e+00 : f32
    %181 = vector.shape_cast %180 : vector<1x256xi1> to vector<1x256xi1>
    %182 = vector.broadcast %181 : vector<1x256xi1> to vector<16x256xi1>
    %183 = vector.broadcast %cst_37 : f32 to vector<16x256xf32>
    %184 = arith.select %182, %178, %183 : vector<16x256xi1>, vector<16x256xf32>
    %185 = vector.extract_strided_slice %2 {offsets = [0, 15], sizes = [16, 1], strides = [1, 1]} : vector<16x25xf32> to vector<16x1xf32>
    %186 = vector.broadcast %185 : vector<16x1xf32> to vector<16x256xf32>
    %187 = arith.mulf %184, %186 : vector<16x256xf32>
    %188 = arith.addf %177, %187 : vector<16x256xf32>
    %c251_i32 = arith.constant 251 : i32
    %189 = tpu.dynamic_rotate %1 by %c251_i32 dim 1 : vector<16x256xf32>, i32 -> vector<16x256xf32>
    %c11_i32 = arith.constant 11 : i32
    %190 = vector.broadcast %c11_i32 : i32 to vector<1x256xi32>
    %191 = arith.cmpi slt, %6, %190 : vector<1x256xi32>
    %cst_38 = arith.constant 0.000000e+00 : f32
    %192 = vector.shape_cast %191 : vector<1x256xi1> to vector<1x256xi1>
    %193 = vector.broadcast %192 : vector<1x256xi1> to vector<16x256xi1>
    %194 = vector.broadcast %cst_38 : f32 to vector<16x256xf32>
    %195 = arith.select %193, %189, %194 : vector<16x256xi1>, vector<16x256xf32>
    %196 = vector.extract_strided_slice %2 {offsets = [0, 16], sizes = [16, 1], strides = [1, 1]} : vector<16x25xf32> to vector<16x1xf32>
    %197 = vector.broadcast %196 : vector<16x1xf32> to vector<16x256xf32>
    %198 = arith.mulf %195, %197 : vector<16x256xf32>
    %199 = arith.addf %188, %198 : vector<16x256xf32>
    %c80_i32 = arith.constant 80 : i32
    %200 = tpu.dynamic_rotate %1 by %c80_i32 dim 1 : vector<16x256xf32>, i32 -> vector<16x256xf32>
    %c80_i32_39 = arith.constant 80 : i32
    %201 = vector.broadcast %c80_i32_39 : i32 to vector<1x256xi32>
    %202 = arith.cmpi sge, %4, %201 : vector<1x256xi32>
    %cst_40 = arith.constant 0.000000e+00 : f32
    %203 = vector.shape_cast %202 : vector<1x256xi1> to vector<1x256xi1>
    %204 = vector.broadcast %203 : vector<1x256xi1> to vector<16x256xi1>
    %205 = vector.broadcast %cst_40 : f32 to vector<16x256xf32>
    %206 = arith.select %204, %200, %205 : vector<16x256xi1>, vector<16x256xf32>
    %207 = vector.extract_strided_slice %2 {offsets = [0, 17], sizes = [16, 1], strides = [1, 1]} : vector<16x25xf32> to vector<16x1xf32>
    %208 = vector.broadcast %207 : vector<16x1xf32> to vector<16x256xf32>
    %209 = arith.mulf %206, %208 : vector<16x256xf32>
    %210 = arith.addf %199, %209 : vector<16x256xf32>
    %c64_i32 = arith.constant 64 : i32
    %211 = tpu.dynamic_rotate %1 by %c64_i32 dim 1 : vector<16x256xf32>, i32 -> vector<16x256xf32>
    %c64_i32_41 = arith.constant 64 : i32
    %212 = vector.broadcast %c64_i32_41 : i32 to vector<1x256xi32>
    %213 = arith.cmpi sge, %4, %212 : vector<1x256xi32>
    %cst_42 = arith.constant 0.000000e+00 : f32
    %214 = vector.shape_cast %213 : vector<1x256xi1> to vector<1x256xi1>
    %215 = vector.broadcast %214 : vector<1x256xi1> to vector<16x256xi1>
    %216 = vector.broadcast %cst_42 : f32 to vector<16x256xf32>
    %217 = arith.select %215, %211, %216 : vector<16x256xi1>, vector<16x256xf32>
    %218 = vector.extract_strided_slice %2 {offsets = [0, 18], sizes = [16, 1], strides = [1, 1]} : vector<16x25xf32> to vector<16x1xf32>
    %219 = vector.broadcast %218 : vector<16x1xf32> to vector<16x256xf32>
    %220 = arith.mulf %217, %219 : vector<16x256xf32>
    %221 = arith.addf %210, %220 : vector<16x256xf32>
    %c48_i32 = arith.constant 48 : i32
    %222 = tpu.dynamic_rotate %1 by %c48_i32 dim 1 : vector<16x256xf32>, i32 -> vector<16x256xf32>
    %c48_i32_43 = arith.constant 48 : i32
    %223 = vector.broadcast %c48_i32_43 : i32 to vector<1x256xi32>
    %224 = arith.cmpi sge, %4, %223 : vector<1x256xi32>
    %cst_44 = arith.constant 0.000000e+00 : f32
    %225 = vector.shape_cast %224 : vector<1x256xi1> to vector<1x256xi1>
    %226 = vector.broadcast %225 : vector<1x256xi1> to vector<16x256xi1>
    %227 = vector.broadcast %cst_44 : f32 to vector<16x256xf32>
    %228 = arith.select %226, %222, %227 : vector<16x256xi1>, vector<16x256xf32>
    %229 = vector.extract_strided_slice %2 {offsets = [0, 19], sizes = [16, 1], strides = [1, 1]} : vector<16x25xf32> to vector<16x1xf32>
    %230 = vector.broadcast %229 : vector<16x1xf32> to vector<16x256xf32>
    %231 = arith.mulf %228, %230 : vector<16x256xf32>
    %232 = arith.addf %221, %231 : vector<16x256xf32>
    %c32_i32 = arith.constant 32 : i32
    %233 = tpu.dynamic_rotate %1 by %c32_i32 dim 1 : vector<16x256xf32>, i32 -> vector<16x256xf32>
    %c32_i32_45 = arith.constant 32 : i32
    %234 = vector.broadcast %c32_i32_45 : i32 to vector<1x256xi32>
    %235 = arith.cmpi sge, %4, %234 : vector<1x256xi32>
    %cst_46 = arith.constant 0.000000e+00 : f32
    %236 = vector.shape_cast %235 : vector<1x256xi1> to vector<1x256xi1>
    %237 = vector.broadcast %236 : vector<1x256xi1> to vector<16x256xi1>
    %238 = vector.broadcast %cst_46 : f32 to vector<16x256xf32>
    %239 = arith.select %237, %233, %238 : vector<16x256xi1>, vector<16x256xf32>
    %240 = vector.extract_strided_slice %2 {offsets = [0, 20], sizes = [16, 1], strides = [1, 1]} : vector<16x25xf32> to vector<16x1xf32>
    %241 = vector.broadcast %240 : vector<16x1xf32> to vector<16x256xf32>
    %242 = arith.mulf %239, %241 : vector<16x256xf32>
    %243 = arith.addf %232, %242 : vector<16x256xf32>
    %c224_i32 = arith.constant 224 : i32
    %244 = tpu.dynamic_rotate %1 by %c224_i32 dim 1 : vector<16x256xf32>, i32 -> vector<16x256xf32>
    %c224_i32_47 = arith.constant 224 : i32
    %245 = vector.broadcast %c224_i32_47 : i32 to vector<1x256xi32>
    %246 = arith.cmpi slt, %4, %245 : vector<1x256xi32>
    %cst_48 = arith.constant 0.000000e+00 : f32
    %247 = vector.shape_cast %246 : vector<1x256xi1> to vector<1x256xi1>
    %248 = vector.broadcast %247 : vector<1x256xi1> to vector<16x256xi1>
    %249 = vector.broadcast %cst_48 : f32 to vector<16x256xf32>
    %250 = arith.select %248, %244, %249 : vector<16x256xi1>, vector<16x256xf32>
    %251 = vector.extract_strided_slice %2 {offsets = [0, 21], sizes = [16, 1], strides = [1, 1]} : vector<16x25xf32> to vector<16x1xf32>
    %252 = vector.broadcast %251 : vector<16x1xf32> to vector<16x256xf32>
    %253 = arith.mulf %250, %252 : vector<16x256xf32>
    %254 = arith.addf %243, %253 : vector<16x256xf32>
    %c208_i32 = arith.constant 208 : i32
    %255 = tpu.dynamic_rotate %1 by %c208_i32 dim 1 : vector<16x256xf32>, i32 -> vector<16x256xf32>
    %c208_i32_49 = arith.constant 208 : i32
    %256 = vector.broadcast %c208_i32_49 : i32 to vector<1x256xi32>
    %257 = arith.cmpi slt, %4, %256 : vector<1x256xi32>
    %cst_50 = arith.constant 0.000000e+00 : f32
    %258 = vector.shape_cast %257 : vector<1x256xi1> to vector<1x256xi1>
    %259 = vector.broadcast %258 : vector<1x256xi1> to vector<16x256xi1>
    %260 = vector.broadcast %cst_50 : f32 to vector<16x256xf32>
    %261 = arith.select %259, %255, %260 : vector<16x256xi1>, vector<16x256xf32>
    %262 = vector.extract_strided_slice %2 {offsets = [0, 22], sizes = [16, 1], strides = [1, 1]} : vector<16x25xf32> to vector<16x1xf32>
    %263 = vector.broadcast %262 : vector<16x1xf32> to vector<16x256xf32>
    %264 = arith.mulf %261, %263 : vector<16x256xf32>
    %265 = arith.addf %254, %264 : vector<16x256xf32>
    %c192_i32 = arith.constant 192 : i32
    %266 = tpu.dynamic_rotate %1 by %c192_i32 dim 1 : vector<16x256xf32>, i32 -> vector<16x256xf32>
    %c192_i32_51 = arith.constant 192 : i32
    %267 = vector.broadcast %c192_i32_51 : i32 to vector<1x256xi32>
    %268 = arith.cmpi slt, %4, %267 : vector<1x256xi32>
    %cst_52 = arith.constant 0.000000e+00 : f32
    %269 = vector.shape_cast %268 : vector<1x256xi1> to vector<1x256xi1>
    %270 = vector.broadcast %269 : vector<1x256xi1> to vector<16x256xi1>
    %271 = vector.broadcast %cst_52 : f32 to vector<16x256xf32>
    %272 = arith.select %270, %266, %271 : vector<16x256xi1>, vector<16x256xf32>
    %273 = vector.extract_strided_slice %2 {offsets = [0, 23], sizes = [16, 1], strides = [1, 1]} : vector<16x25xf32> to vector<16x1xf32>
    %274 = vector.broadcast %273 : vector<16x1xf32> to vector<16x256xf32>
    %275 = arith.mulf %272, %274 : vector<16x256xf32>
    %276 = arith.addf %265, %275 : vector<16x256xf32>
    %c176_i32 = arith.constant 176 : i32
    %277 = tpu.dynamic_rotate %1 by %c176_i32 dim 1 : vector<16x256xf32>, i32 -> vector<16x256xf32>
    %c176_i32_53 = arith.constant 176 : i32
    %278 = vector.broadcast %c176_i32_53 : i32 to vector<1x256xi32>
    %279 = arith.cmpi slt, %4, %278 : vector<1x256xi32>
    %cst_54 = arith.constant 0.000000e+00 : f32
    %280 = vector.shape_cast %279 : vector<1x256xi1> to vector<1x256xi1>
    %281 = vector.broadcast %280 : vector<1x256xi1> to vector<16x256xi1>
    %282 = vector.broadcast %cst_54 : f32 to vector<16x256xf32>
    %283 = arith.select %281, %277, %282 : vector<16x256xi1>, vector<16x256xf32>
    %284 = vector.extract_strided_slice %2 {offsets = [0, 24], sizes = [16, 1], strides = [1, 1]} : vector<16x25xf32> to vector<16x1xf32>
    %285 = vector.broadcast %284 : vector<16x1xf32> to vector<16x256xf32>
    %286 = arith.mulf %283, %285 : vector<16x256xf32>
    %287 = arith.addf %276, %286 : vector<16x256xf32>
    %288 = vector.broadcast %3 : vector<16x1xf32> to vector<16x256xf32>
    %289 = arith.addf %287, %288 : vector<16x256xf32>
    %290 = tpu.iota {dimensions = array<i32: 0>} : vector<16x1xi32>
    %c4_i32_55 = arith.constant 4 : i32
    %291 = vector.broadcast %c4_i32_55 : i32 to vector<16x1xi32>
    %292 = arith.cmpi sge, %290, %291 : vector<16x1xi32>
    %cst_56 = arith.constant 0.000000e+00 : f32
    %293 = vector.broadcast %cst_56 : f32 to vector<16x256xf32>
    %294 = arith.maximumf %289, %293 : vector<16x256xf32>
    %295 = vector.shape_cast %292 : vector<16x1xi1> to vector<16x1xi1>
    %296 = vector.broadcast %295 : vector<16x1xi1> to vector<16x256xi1>
    %297 = arith.select %296, %294, %289 : vector<16x256xi1>, vector<16x256xf32>
    %c0_57 = arith.constant 0 : index
    %c0_58 = arith.constant 0 : index
    %c0_59 = arith.constant 0 : index
    %298 = vector.load %arg4[%c0_57, %c0_58, %c0_59] : memref<1x16x256xf32, #tpu.memory_space<vmem>>, vector<1x16x256xf32>
    %299 = vector.shape_cast %298 : vector<1x16x256xf32> to vector<16x256xf32>
    %300 = vector.shape_cast %297 : vector<16x256xf32> to vector<1x16x256xf32>
    tpu.vector_store %arg4[%c0_57, %c0_58, %c0_59], %300 {strides = array<i32>} : memref<1x16x256xf32, #tpu.memory_space<vmem>>, vector<1x16x256xf32>,
    return
  }
  func.func @transform_0(%arg0: i32) -> (i32, i32, i32) {
    %c1_i32 = arith.constant 1 : i32
    %c0_i32 = arith.constant 0 : i32
    %c0_i32_0 = arith.constant 0 : i32
    return %arg0, %c1_i32, %c0_i32 : i32, i32, i32
  }
  func.func @transform_1(%arg0: i32) -> (i32, i32) {
    %c0_i32 = arith.constant 0 : i32
    %c0_i32_0 = arith.constant 0 : i32
    %c0_i32_1 = arith.constant 0 : i32
    return %c0_i32, %c0_i32_0 : i32, i32
  }
  func.func @transform_2(%arg0: i32) -> (i32, i32) {
    %c0_i32 = arith.constant 0 : i32
    %c0_i32_0 = arith.constant 0 : i32
    %c0_i32_1 = arith.constant 0 : i32
    return %c0_i32, %c0_i32_0 : i32, i32
  }
  func.func @transform_3(%arg0: i32) -> (i32, i32, i32) {
    %c1_i32 = arith.constant 1 : i32
    %c0_i32 = arith.constant 0 : i32
    %c0_i32_0 = arith.constant 0 : i32
    return %arg0, %c1_i32, %c0_i32 : i32, i32, i32
  }
}

</mosaic_0001>

<bundles_post_ra>
// kernel: inception_dwconv2d.1
= control target key start
LH: loop header
LB: loop body
LE: loop exit
PB: predicated region body
PF: predicated region fallthrough
CT: control target
= control target key end

     0   :  { %s1412_s12 = smov 0   ;;  %s2297_s0 = inlined_call_operand.vmem [shape: f32[2,32,256], index: 0, kind: input, shape index: {}, may-alias: {0,3}]   ;;  %s2298_s1 = inlined_call_operand.vmem [shape: f32[16,25], index: 1, kind: input, shape index: {}]   ;;  %s2299_s2 = inlined_call_operand.vmem [shape: f32[16,1], index: 2, kind: input, shape index: {}]   ;;  %s2300_s3 = inlined_call_operand.vmem [shape: f32[2,32,256], index: 3, kind: output, shape index: {}, may-alias: {0,3}]  }
   0x1 LB: > { %s1210_s13 = sadd.s32 4294967295, %s1344_s12   ;;  %p1214_p0 = scmp.ge.s32.totalorder %s1344_s12, 1  ;;  %s1344_s12 = sphi %s1412_s12, %s13_s12  }
   0x2   : > { %p138_p1 = scmp.lt.s32.totalorder %s1344_s12, 3 }
   0x4   : > { %p139_p2 = pnand %p1214_p0, %p138_p1 }
   0x5   : > { %p164_p3 = scmp.lt.s32.totalorder (!%p139_p2), %s1210_s13, 1  ;;  %s1347_s18 = smov (!%p139_p2), 17  }
   0x6   : > { %142 = sbr.rel (%p139_p2) target bundleno = 460 (0x1cc), region = 32  ;;  %s1348_s23 = smov (!%p139_p2), 16  }
   0x7   : > { %s1350_s24 = smov (!%p139_p2), 15   ;;  %s1352_s25 = smov (!%p139_p2), 1  }
   0x8   : > { %s1354_s26 = smov (!%p139_p2), 127   ;;  %s1357_s27 = smov (!%p139_p2), 113  }
   0x9   : > { %s1359_s28 = smov (!%p139_p2), 112   ;;  %s1361_s29 = smov (!%p139_p2), 111  }
   0xa   : > { %s1363_s30 = smov (!%p139_p2), 5   ;;  %s1365_s4 = smov (!%p139_p2), 4  }
   0xb   : > { %v1346_v0 = vmov 0   ;;  %s2310_s13 = smov (!%p164_p3, %s1210_s13), 1  ;;  %v1451_v5 = vld [vmem:[%s2298_s1 + $0x8] sm:$0xff]  ;;  %v1456_v6 = vld [vmem:[%s2298_s1] sm:$0xff]  ;;  %v1349_v7 = vmov 1   ;;  %v1351_v8 = vmov 2   ;;  %v184_v33 = vlaneseq }
   0xc   : > { %1286 = vset.pattern.permute.xlu1 %v1346_v0  ;;  %1285 = vset.pattern.permute.xlu0 %v1346_v0  ;;  %s1229_s14 = sshll.u32 %s2310_s13, 6  ;;  %v1353_v9 = vmov 3   ;;  %v1355_v10 = vmov 5   ;;  %v1356_v11 = vmov 4   ;;  %v1358_v12 = vmov 6   ;;  %s1367_s5 = smov 3  }
   0xd   : > { %s1430_s17 = scalar_lea.vmem %s2297_s0, %s1229_s14  ;;  %v1360_v13 = vmov 7   ;;  %v1362_v14 = vmov 8   ;;  %v1364_v15 = vmov 9   ;;  %v1366_v16 = vmov 10   ;;  %s1369_s6 = smov 2  }
   0xe   : > { %v1433_v1 = vld [vmem:[%s1430_s17 + $0x28] sm:$0xff]  ;;  %v1436_v2 = vld [vmem:[%s1430_s17 + $0x20] sm:$0xff]  ;;  %v1441_v3 = vld [vmem:[%s1430_s17 + $0x38] sm:$0xff]  ;;  %v1368_v17 = vmov 11   ;;  %v1370_v18 = vmov 12   ;;  %s1371_s7 = smov 126  }
   0xf   : > { %193 = vrot.lane.b32.xlu1 %v1433_v1, %s1347_s18  ;;  %189 = vrot.lane.b32.xlu0 %v1436_v2, %s1347_s18  ;;  %v1444_v4 = vld [vmem:[%s1430_s17 + $0x30] sm:$0xff]  ;;  %v1372_v23 = vmov 13   ;;  %s1373_s8 = smov 125   ;;  %v1374_v28 = vmov 14   ;;  %v1575_v36 = vand.u32 127, %v184_v33  ;;  %s1375_s9 = smov 124  }
  0x10   : > { %v1376_v37 = vmov 15   ;;  %s1377_s10 = smov 123   ;;  %v1378_v45 = vmov 16   ;;  %s1379_s11 = smov 80   ;;  %v1380_v58 = vmov 17  }
  0x11   : > { %v1587_v40 = vadd.s32 128, %v1575_v36  ;;  %v1594_v43 = vand.u32 15, %v1575_v36  ;;  %vm320_vm0 = vcmp.lt.s32.totalorder %v1575_v36, 1  ;;  %vm373_vm3 = vcmp.lt.s32.totalorder %v1575_v36, 127  ;;  %s1381_s15 = smov 64   ;;  %s1384_s16 = smov 48  }
  0x12   : > { %vm242_vm6 = vcmp.lt.s32.totalorder %v1575_v36, 16  ;;  %vm202_vm7 = vcmp.ge.s32.totalorder %v1575_v36, 16  ;;  %vm197_vm8 = vcmp.lt.s32.totalorder %v1575_v36, 17  ;;  %vm279_vm9 = vcmp.lt.s32.totalorder %v1575_v36, 15  ;;  %s1388_s19 = smov 96  }
  0x13   : > { %195 = vrot.lane.b32.xlu1 %v1441_v3, %s1347_s18  ;;  %191 = vrot.lane.b32.xlu0 %v1444_v4, %s1347_s18  ;;  %v1597_v44 = vand.u32 15, %v1587_v40  ;;  %vm204_vm1 = vcmp.ge.s32.totalorder %v1594_v43, 1  ;;  %vm284_vm4 = vcmp.lt.s32.totalorder %v1594_v43, 15  ;;  %vm416_vm10 = vcmp.lt.s32.totalorder %v1587_v40, 240  ;;  %s1386_s18 = smov 32  }
  0x14   : > { %vm1695_vm11 = vmand %vm202_vm7, %vm204_vm1  ;;  %vm410_vm13 = vcmp.lt.s32.totalorder %v1575_v36, 113  ;;  %vm488_vm15 = vcmp.lt.s32.totalorder %v1575_v36, 111 }
  0x15   : > { %vm205_vm2 = vcmp.ge.s32.totalorder %v1597_v44, 1  ;;  %vm285_vm5 = vcmp.lt.s32.totalorder %v1597_v44, 15  ;;  %vm1710_vm12 = vmand %vm202_vm7, %vm284_vm4 }
  0x16   : > { %vm1725_vm14 = vmand %vm416_vm10, %vm205_vm2 }
  0x17   : > { %223 = vperm.xlu1 %1286, %v1451_v5   ;;  %218 = vperm.xlu0 %1285, %v1456_v6  }
  0x1b   : > { %234 = vrot.lane.b32.xlu1 %v1436_v2, %s1348_s23  ;;  %236 = vrot.lane.b32.xlu0 %v1444_v4, %s1348_s23 }
  0x1c   : > { %1287 = vset.pattern.permute.xlu1 %v1349_v7  ;;  %1288 = vset.pattern.permute.xlu0 %v1349_v7 }
  0x1f   : > { %238 = vrot.lane.b32.xlu1 %v1433_v1, %s1348_s23  ;;  %240 = vrot.lane.b32.xlu0 %v1441_v3, %s1348_s23 }
  0x23   : > { %256 = vperm.xlu1 %1287, %v1456_v6   ;;  %260 = vperm.xlu0 %1288, %v1451_v5  }
  0x27   : > { %271 = vrot.lane.b32.xlu1 %v1436_v2, %s1350_s24  ;;  %275 = vrot.lane.b32.xlu0 %v1433_v1, %s1350_s24 }
  0x28   : > { %1289 = vset.pattern.permute.xlu0 %v1351_v8  ;;  %1290 = vset.pattern.permute.xlu1 %v1351_v8 }
  0x2b   : > { %273 = vrot.lane.b32.xlu1 %v1444_v4, %s1350_s24  ;;  %297 = vperm.xlu0 %1289, %v1456_v6  }
  0x2f   : > { %277 = vrot.lane.b32.xlu1 %v1441_v3, %s1350_s24  ;;  %314 = vrot.lane.b32.xlu0 %v1444_v4, %s1352_s25 }
  0x30   : > { %1292 = vset.pattern.permute.xlu0 %v1353_v9 }
  0x33   : > { %301 = vperm.xlu1 %1290, %v1451_v5   ;;  %318 = vrot.lane.b32.xlu0 %v1441_v3, %s1352_s25 }
  0x37   : > { %312 = vrot.lane.b32.xlu1 %v1436_v2, %s1352_s25  ;;  %338 = vperm.xlu0 %1292, %v1451_v5  }
  0x38   : > { %1291 = vset.pattern.permute.xlu1 %v1353_v9 }
  0x3b   : > { %316 = vrot.lane.b32.xlu1 %v1433_v1, %s1352_s25  ;;  %365 = vrot.lane.b32.xlu0 %v1436_v2, %s1354_s26 }
  0x3c   : > { %1294 = vset.pattern.permute.xlu0 %v1355_v10 }
  0x3f   : > { %334 = vperm.xlu1 %1291, %v1456_v6   ;;  %369 = vrot.lane.b32.xlu0 %v1433_v1, %s1354_s26 }
  0x43   : > { %1293 = vset.pattern.permute.xlu1 %v1356_v11  ;;  %387 = vperm.xlu0 %1294, %v1456_v6  }
  0x44   : > { %350 = vperm.xlu1 %1293, %v1456_v6  }
  0x47   : > { %404 = vrot.lane.b32.xlu0 %v1444_v4, %s1357_s27 }
  0x48   : > { %354 = vperm.xlu1 %1293, %v1451_v5   ;;  %1297 = vset.pattern.permute.xlu0 %v1358_v12 }
  0x4b   : > { %408 = vrot.lane.b32.xlu0 %v1441_v3, %s1357_s27 }
  0x4c   : > { %367 = vrot.lane.b32.xlu1 %v1444_v4, %s1354_s26 }
  0x4d   : > { %1295 = vset.pattern.permute.xlu1 %v1355_v10 }
  0x4f   : > { %432 = vperm.xlu0 %1297, %v1451_v5  }
  0x50   : > { %371 = vrot.lane.b32.xlu1 %v1441_v3, %s1354_s26 }
  0x53   : > { %447 = vrot.lane.b32.xlu0 %v1433_v1, %s1359_s28 }
  0x54   : > { %391 = vperm.xlu1 %1295, %v1451_v5   ;;  %1298 = vset.pattern.permute.xlu0 %v1360_v13 }
  0x57   : > { %465 = vperm.xlu0 %1298, %v1456_v6  }
  0x58   : > { %402 = vrot.lane.b32.xlu1 %v1436_v2, %s1357_s27 }
  0x59   : > { %1296 = vset.pattern.permute.xlu1 %v1358_v12 }
  0x5b   : > { %482 = vrot.lane.b32.xlu0 %v1444_v4, %s1361_s29 }
  0x5c   : > { %406 = vrot.lane.b32.xlu1 %v1433_v1, %s1357_s27  ;;  %1301 = vset.pattern.permute.xlu0 %v1362_v14 }
  0x5f   : > { %486 = vrot.lane.b32.xlu0 %v1441_v3, %s1361_s29 }
  0x60   : > { %428 = vperm.xlu1 %1296, %v1456_v6  }
  0x63   : > { %508 = vperm.xlu0 %1301, %v1451_v5  }
  0x64   : > { %443 = vrot.lane.b32.xlu1 %v1436_v2, %s1359_s28 }
  0x65   : > { %1299 = vset.pattern.permute.xlu1 %v1360_v13  ;;  %v1382_v13 = vmov 18  }
  0x67   : > { %523 = vrot.lane.b32.xlu0 %v1433_v1, %s1363_s30 }
  0x68   : > { %445 = vrot.lane.b32.xlu1 %v1444_v4, %s1359_s28  ;;  %1302 = vset.pattern.permute.xlu0 %v1364_v15 }
  0x6b   : > { %543 = vperm.xlu0 %1302, %v1456_v6  }
  0x6c   : > { %449 = vrot.lane.b32.xlu1 %v1441_v3, %s1359_s28 }
  0x6f   : > { %560 = vrot.lane.b32.xlu0 %v1444_v4, %s1365_s4 }
  0x70   : > { %469 = vperm.xlu1 %1299, %v1451_v5   ;;  %1305 = vset.pattern.permute.xlu0 %v1366_v16 }
  0x73   : > { %564 = vrot.lane.b32.xlu0 %v1441_v3, %s1365_s4 }
  0x74   : > { %480 = vrot.lane.b32.xlu1 %v1436_v2, %s1361_s29 }
  0x75   : > { %1300 = vset.pattern.permute.xlu1 %v1362_v14 }
  0x77   : > { %586 = vperm.xlu0 %1305, %v1451_v5  }
  0x78   : > { %484 = vrot.lane.b32.xlu1 %v1433_v1, %s1361_s29  ;;  %s1180_s29 = scalar_lea.vmem %s2300_s3, %s1229_s14 }
  0x7b   : > { %601 = vrot.lane.b32.xlu0 %v1433_v1, %s1367_s5 }
  0x7c   : > { %504 = vperm.xlu1 %1300, %v1456_v6   ;;  %1306 = vset.pattern.permute.xlu0 %v1368_v17 }
  0x7f   : > { %621 = vperm.xlu0 %1306, %v1456_v6  }
  0x80   : > { %519 = vrot.lane.b32.xlu1 %v1436_v2, %s1363_s30 }
  0x81   : > { %1303 = vset.pattern.permute.xlu1 %v1364_v15  ;;  %v1523_v19 = vpop.permute.xlu1 %193  ;;  %v1525_v20 = vpop.permute.xlu0 %189 }
  0x83   : > { %638 = vrot.lane.b32.xlu0 %v1444_v4, %s1369_s6 }
  0x84   : > { %521 = vrot.lane.b32.xlu1 %v1444_v4, %s1363_s30  ;;  %1309 = vset.pattern.permute.xlu0 %v1370_v18 }
  0x85   : > { %v1531_v21 = vpop.permute.xlu1 %195  ;;  %v1533_v22 = vpop.permute.xlu0 %191 }
  0x86   : > { %v201_v15 = vsel %vm197_vm8, %v1531_v21, %v1533_v22 }
  0x87   : > { %642 = vrot.lane.b32.xlu0 %v1441_v3, %s1369_s6 }
  0x88   : > { %525 = vrot.lane.b32.xlu1 %v1441_v3, %s1363_s30 }
  0x8b   : > { %664 = vperm.xlu0 %1309, %v1451_v5  }
  0x8c   : > { %547 = vperm.xlu1 %1303, %v1451_v5  }
  0x8f   : > { %679 = vrot.lane.b32.xlu0 %v1433_v1, %s1371_s7 }
  0x90   : > { %558 = vrot.lane.b32.xlu1 %v1436_v2, %s1365_s4  ;;  %1310 = vset.pattern.permute.xlu0 %v1372_v23 }
  0x91   : > { %1304 = vset.pattern.permute.xlu1 %v1366_v16 }
  0x92   : > { %v1540_v24 = vpop.permute.xlu1 %223  ;;  %v1542_v25 = vpop.permute.xlu0 %218 }
  0x93   : > { %699 = vperm.xlu0 %1310, %v1456_v6  }
  0x94   : > { %562 = vrot.lane.b32.xlu1 %v1433_v1, %s1365_s4 }
  0x96   : > { %v1547_v26 = vpop.permute.xlu1 %234  ;;  %v1549_v27 = vpop.permute.xlu0 %236 }
  0x97   : > { %716 = vrot.lane.b32.xlu0 %v1444_v4, %s1373_s8 }
  0x98   : > { %582 = vperm.xlu1 %1304, %v1456_v6   ;;  %1313 = vset.pattern.permute.xlu0 %v1374_v28 }
  0x9a   : > { %v1555_v29 = vpop.permute.xlu1 %238  ;;  %v1557_v30 = vpop.permute.xlu0 %240 }
  0x9b   : > { %720 = vrot.lane.b32.xlu0 %v1441_v3, %s1373_s8  ;;  %v246_v8 = vsel %vm242_vm6, %v1557_v30, %v1549_v27  ;;  %v244_v16 = vsel %vm242_vm6, %v1549_v27, %v1557_v30 }
  0x9c   : > { %597 = vrot.lane.b32.xlu1 %v1436_v2, %s1367_s5  ;;  %v253_v14 = vsel %vm202_vm7, %v246_v8, 0.0 }
  0x9d   : > { %1307 = vset.pattern.permute.xlu1 %v1368_v17 }
  0x9e   : > { %v1563_v31 = vpop.permute.xlu1 %256  ;;  %v1565_v32 = vpop.permute.xlu0 %260 }
  0x9f   : > { %742 = vperm.xlu0 %1313, %v1451_v5  }
  0xa0   : > { %599 = vrot.lane.b32.xlu1 %v1444_v4, %s1367_s5 }
  0xa2   : > { %v1570_v34 = vpop.permute.xlu1 %271  ;;  %v1572_v35 = vpop.permute.xlu0 %275 }
  0xa3   : > { %757 = vrot.lane.b32.xlu0 %v1433_v1, %s1375_s9 }
  0xa4   : > { %603 = vrot.lane.b32.xlu1 %v1441_v3, %s1367_s5  ;;  %1314 = vset.pattern.permute.xlu0 %v1376_v37 }
  0xa6   : > { %v1582_v38 = vpop.permute.xlu1 %273  ;;  %v1584_v39 = vpop.permute.xlu0 %297 }
  0xa7   : > { %777 = vperm.xlu0 %1314, %v1456_v6  }
  0xa8   : > { %625 = vperm.xlu1 %1307, %v1451_v5  }
  0xaa   : > { %v1591_v41 = vpop.permute.xlu1 %277  ;;  %v315_v42 = vpop.permute.xlu0 %314 }
  0xab   : > { %794 = vrot.lane.b32.xlu0 %v1444_v4, %s1377_s10  ;;  %v283_v17 = vsel %vm279_vm9, %v1591_v41, %v1582_v38  ;;  %v281_v27 = vsel %vm279_vm9, %v1582_v38, %v1591_v41  ;;  %v266_v38 = vmul.f32 %v1565_v32, %v244_v16 }
  0xac   : > { %636 = vrot.lane.b32.xlu1 %v1436_v2, %s1369_s6  ;;  %1317 = vset.pattern.permute.xlu0 %v1378_v45  ;;  %v294_v41 = vsel %vm1710_vm12, %v283_v17, 0.0 }
  0xad   : > { %1308 = vset.pattern.permute.xlu1 %v1370_v18 }
  0xae   : > { %v1605_v46 = vpop.permute.xlu1 %301  ;;  %v319_v47 = vpop.permute.xlu0 %318 }
  0xaf   : > { %v322_v48 = vsel %vm320_vm0, %v315_v42, %v319_v47  ;;  %v324_v49 = vsel %vm320_vm0, %v319_v47, %v315_v42  ;;  %798 = vrot.lane.b32.xlu0 %v1441_v3, %s1377_s10  ;;  %v265_v47 = vmul.f32 %v1565_v32, %v253_v14  ;;  %v306_v32 = vmul.f32 %v1605_v46, %v294_v41 }
  0xb0   : > { %640 = vrot.lane.b32.xlu1 %v1433_v1, %s1369_s6  ;;  %v331_v50 = vsel %vm204_vm1, %v324_v49, 0.0  ;;  %v332_v51 = vsel %vm205_vm2, %v322_v48, 0.0  ;;  %v198_v41 = vsel %vm197_vm8, %v1525_v20, %v1523_v19 }
  0xb2   : > { %v1621_v52 = vpop.permute.xlu1 %312  ;;  %v339_v53 = vpop.permute.xlu0 %338 }
  0xb3   : > { %v1623_v54 = vmul.f32 %v339_v53, %v331_v50  ;;  %v1625_v55 = vmul.f32 %v339_v53, %v332_v51  ;;  %820 = vperm.xlu0 %1317, %v1451_v5   ;;  %v295_v51 = vsel %vm285_vm5, %v281_v27, 0.0 }
  0xb4   : > { %660 = vperm.xlu1 %1308, %v1456_v6  }
  0xb6   : > { %v1629_v56 = vpop.permute.xlu1 %316  ;;  %v366_v57 = vpop.permute.xlu0 %365 }
  0xb7   : > { %835 = vrot.lane.b32.xlu0 %v1433_v1, %s1379_s11 }
  0xb8   : > { %675 = vrot.lane.b32.xlu1 %v1436_v2, %s1371_s7  ;;  %1318 = vset.pattern.permute.xlu0 %v1380_v58 }
  0xb9   : > { %1311 = vset.pattern.permute.xlu1 %v1372_v23  ;;  %v199_v23 = vsel %vm197_vm8, %v1533_v22, %v1531_v21  ;;  %v214_v22 = vsel %vm1695_vm11, %v201_v15, 0.0 }
  0xba   : > { %v1638_v59 = vpop.permute.xlu1 %334  ;;  %v370_v60 = vpop.permute.xlu0 %369  ;;  %v215_v49 = vsel %vm205_vm2, %v199_v23, 0.0  ;;  %v228_v50 = vmul.f32 %v1540_v24, %v214_v22 }
  0xbb   : > { %v374_v61 = vsel %vm373_vm3, %v366_v57, %v370_v60  ;;  %v376_v62 = vsel %vm373_vm3, %v370_v60, %v366_v57  ;;  %855 = vperm.xlu0 %1318, %v1456_v6   ;;  %v229_v57 = vmul.f32 %v1540_v24, %v215_v49  ;;  %v307_v60 = vmul.f32 %v1605_v46, %v295_v51 }
  0xbc   : > { %677 = vrot.lane.b32.xlu1 %v1444_v4, %s1371_s7  ;;  %v382_v63 = vsel %vm284_vm4, %v374_v61, 0.0  ;;  %v383_v7 = vsel %vm285_vm5, %v376_v62, 0.0  ;;  %v243_v51 = vsel %vm242_vm6, %v1547_v26, %v1555_v29 }
  0xbd   : > { %v270_v46 = vadd.f32 %v266_v38, %v229_v57 }
  0xbe   : > { %v388_v9 = vpop.permute.xlu0 %387 }
  0xbf   : > { %v1658_v10 = vpop.permute.xlu1 %350  ;;  %v1660_v11 = vmul.f32 %v388_v9, %v382_v63  ;;  %v1662_v12 = vmul.f32 %v388_v9, %v383_v7  ;;  %872 = vrot.lane.b32.xlu0 %v1444_v4, %s1381_s15  ;;  %v269_v7 = vadd.f32 %v265_v47, %v228_v50  ;;  %v200_v9 = vsel %vm197_vm8, %v1523_v19, %v1525_v20 }
  0xc0   : > { %681 = vrot.lane.b32.xlu1 %v1441_v3, %s1371_s7  ;;  %1321 = vset.pattern.permute.xlu0 %v1382_v13  ;;  %v311_v16 = vadd.f32 %v307_v60, %v270_v46  ;;  %v1383_v47 = vmov 20   ;;  %v212_v50 = vsel %vm1695_vm11, %v200_v9, 0.0  ;;  %v280_v19 = vsel %vm279_vm9, %v1570_v34, %v1572_v35 }
  0xc1   : > { %v310_v14 = vadd.f32 %v306_v32, %v269_v7  ;;  %vm533_vm8 = vcmp.ge.s32.totalorder %v1597_v44, 5  ;;  %vm605_vm11 = vcmp.lt.s32.totalorder %v1575_v36, 3 }
  0xc2   : > { %v405_v18 = vpop.permute.xlu0 %404  ;;  %v348_v20 = vadd.f32 %v1625_v55, %v311_v16 }
  0xc3   : > { %v355_v30 = vpop.permute.xlu1 %354  ;;  %876 = vrot.lane.b32.xlu0 %v1441_v3, %s1381_s15  ;;  %v347_v49 = vadd.f32 %v1623_v54, %v310_v14  ;;  %v282_v54 = vsel %vm279_vm9, %v1572_v35, %v1570_v34  ;;  %v213_v34 = vsel %vm205_vm2, %v198_v41, 0.0  ;;  %v226_v14 = vmul.f32 %v1542_v25, %v212_v50 }
  0xc4   : > { %703 = vperm.xlu1 %1311, %v1451_v5   ;;  %v359_v17 = vmul.f32 %v1444_v4, %v355_v30  ;;  %v360_v22 = vmul.f32 %v1441_v3, %v355_v30  ;;  %v245_v30 = vsel %vm242_vm6, %v1555_v29, %v1547_v26  ;;  %v292_v7 = vsel %vm1710_vm12, %v282_v54, 0.0 }
  0xc5   : > { %v251_v57 = vsel %vm202_vm7, %v245_v30, 0.0  ;;  %v304_v16 = vmul.f32 %v1584_v39, %v292_v7  ;;  %v357_v41 = vmul.f32 %v1436_v2, %v1658_v10  ;;  %v358_v50 = vmul.f32 %v1433_v1, %v1658_v10 }
  0xc6   : > { %v409_v53 = vpop.permute.xlu0 %408  ;;  %v363_v42 = vadd.f32 %v359_v17, %v347_v49  ;;  %v364_v60 = vadd.f32 %v360_v22, %v348_v20  ;;  %v263_v35 = vmul.f32 %v1563_v31, %v251_v57  ;;  %v1385_v22 = vmov 21  }
  0xc7   : > { %v368_v61 = vpop.permute.xlu1 %367  ;;  %v412_v62 = vsel %vm410_vm13, %v405_v18, %v409_v53  ;;  %v414_v63 = vsel %vm410_vm13, %v409_v53, %v405_v18  ;;  %898 = vperm.xlu0 %1321, %v1451_v5   ;;  %vm527_vm6 = vcmp.lt.s32.totalorder %v1575_v36, 5  ;;  %vm532_vm7 = vcmp.ge.s32.totalorder %v1594_v43, 5 }
  0xc8   : > { %714 = vrot.lane.b32.xlu1 %v1436_v2, %s1373_s8  ;;  %v425_v8 = vsel %vm204_vm1, %v412_v62, 0.0  ;;  %v426_v24 = vsel %vm1725_vm14, %v414_v63, 0.0  ;;  %v264_v62 = vmul.f32 %v1563_v31, %v243_v51  ;;  %v323_v63 = vsel %vm320_vm0, %v1629_v56, %v1621_v52 }
  0xc9   : > { %1312 = vset.pattern.permute.xlu1 %v1374_v28  ;;  %v227_v31 = vmul.f32 %v1542_v25, %v213_v34  ;;  %v267_v25 = vadd.f32 %v263_v35, %v226_v14  ;;  %vm649_vm9 = vcmp.ge.s32.totalorder %v1594_v43, 2  ;;  %vm610_vm12 = vcmp.ge.s32.totalorder %v1594_v43, 3 }
  0xca   : > { %v433_v15 = vpop.permute.xlu0 %432 }
  0xcb   : > { %v372_v18 = vpop.permute.xlu1 %371  ;;  %v437_v23 = vmul.f32 %v433_v15, %v425_v8  ;;  %v438_v27 = vmul.f32 %v433_v15, %v426_v24  ;;  %1323 = vset.pattern.permute.xlu0 %v1383_v47  ;;  %v321_v8 = vsel %vm320_vm0, %v1621_v52, %v1629_v56  ;;  %v293_v15 = vsel %vm285_vm5, %v280_v19, 0.0  ;;  %vm1849_vm0 = vmand %vm416_vm10, %vm285_vm5 }
  0xcc   : > { %v375_v28 = vsel %vm373_vm3, %v368_v61, %v372_v18  ;;  %v377_v38 = vsel %vm373_vm3, %v372_v18, %v368_v61  ;;  %718 = vrot.lane.b32.xlu1 %v1433_v1, %s1373_s8  ;;  %972 = vperm.xlu0 %1323, %v1456_v6   ;;  %v305_v17 = vmul.f32 %v1584_v39, %v293_v15  ;;  %v329_v18 = vsel %vm204_vm1, %v323_v63, 0.0 }
  0xcd   : > { %v384_v53 = vsel %vm284_vm4, %v375_v28, 0.0  ;;  %v385_v26 = vsel %vm285_vm5, %v377_v38, 0.0  ;;  %v330_v47 = vsel %vm205_vm2, %v321_v8, 0.0  ;;  %v341_v39 = vmul.f32 %v1638_v59, %v329_v18 }
  0xce   : > { %v1782_v32 = vpop.permute.xlu0 %447  ;;  %v308_v38 = vadd.f32 %v304_v16, %v267_v25  ;;  %vm451_vm2 = vcmp.lt.s32.totalorder %v1575_v36, 112  ;;  %vm571_vm3 = vcmp.ge.s32.totalorder %v1594_v43, 4  ;;  %vm572_vm5 = vcmp.ge.s32.totalorder %v1597_v44, 4 }
  0xcf   : > { %v392_v29 = vpop.permute.xlu1 %391 }
  0xd0   : > { %v396_v55 = vmul.f32 %v392_v29, %v384_v53  ;;  %v397_v61 = vmul.f32 %v392_v29, %v385_v26  ;;  %738 = vperm.xlu1 %1312, %v1456_v6   ;;  %976 = vperm.xlu0 %1323, %v1451_v5  }
  0xd2   : > { %v400_v24 = vadd.f32 %v396_v55, %v363_v42  ;;  %v401_v46 = vadd.f32 %v397_v61, %v364_v60  ;;  %v1810_v9 = vpop.permute.xlu0 %465 }
  0xd3   : > { %v403_v21 = vpop.permute.xlu1 %402 }
  0xd4   : > { %v1820_v52 = vadd.f32 %v437_v23, %v400_v24  ;;  %v1822_v56 = vadd.f32 %v438_v27, %v401_v46  ;;  %753 = vrot.lane.b32.xlu1 %v1436_v2, %s1375_s9  ;;  %915 = vrot.lane.b32.xlu0 %v1441_v3, %s1384_s16  ;;  %v268_v23 = vadd.f32 %v264_v62, %v227_v31  ;;  %v1387_v31 = vmov 22  }
  0xd5   : > { %1315 = vset.pattern.permute.xlu1 %v1376_v37  ;;  %1325 = vset.pattern.permute.xlu0 %v1385_v22  ;;  %v342_v27 = vmul.f32 %v1638_v59, %v330_v47  ;;  %v345_v37 = vadd.f32 %v341_v39, %v308_v38 }
  0xd6   : > { %v483_v28 = vpop.permute.xlu0 %482  ;;  %v309_v49 = vadd.f32 %v305_v17, %v268_v23 }
  0xd7   : > { %v407_v30 = vpop.permute.xlu1 %406  ;;  %v361_v54 = vadd.f32 %v357_v41, %v345_v37 }
  0xd8   : > { %755 = vrot.lane.b32.xlu1 %v1444_v4, %s1375_s9  ;;  %948 = vrot.lane.b32.xlu0 %v1436_v2, %s1386_s18  ;;  %v411_v59 = vsel %vm410_vm13, %v403_v21, %v407_v30  ;;  %v346_v10 = vadd.f32 %v342_v27, %v309_v49  ;;  %v413_v19 = vsel %vm410_vm13, %v407_v30, %v403_v21  ;;  %v1389_v27 = vmov 23  }
  0xd9   : > { %v423_v57 = vsel %vm204_vm1, %v411_v59, 0.0  ;;  %v424_v61 = vsel %vm1725_vm14, %v413_v19, 0.0  ;;  %v398_v63 = vadd.f32 %v1660_v11, %v361_v54  ;;  %vm566_vm1 = vcmp.lt.s32.totalorder %v1575_v36, 4 }
  0xda   : > { %v487_v20 = vpop.permute.xlu0 %486  ;;  %v362_v29 = vadd.f32 %v358_v50, %v346_v10  ;;  %vm611_vm13 = vcmp.ge.s32.totalorder %v1597_v44, 3  ;;  %vm683_vm14 = vcmp.lt.s32.totalorder %v1575_v36, 126 }
  0xdb   : > { %v429_v42 = vpop.permute.xlu1 %428  ;;  %v490_v53 = vsel %vm488_vm15, %v483_v28, %v487_v20  ;;  %v492_v26 = vsel %vm488_vm15, %v487_v20, %v483_v28  ;;  %v182_v20 = vld [vmem:[%s2299_s2] sm:$0xff] }
  0xdc   : > { %759 = vrot.lane.b32.xlu1 %v1441_v3, %s1375_s9  ;;  %1015 = vperm.xlu0 %1325, %v1451_v5   ;;  %v501_v60 = vsel %vm284_vm4, %v490_v53, 0.0  ;;  %v502_v55 = vsel %vm1849_vm0, %v492_v26, 0.0  ;;  %v435_v34 = vmul.f32 %v429_v42, %v423_v57  ;;  %v436_v35 = vmul.f32 %v429_v42, %v424_v61 }
  0xdd   : > { %v399_v46 = vadd.f32 %v1662_v12, %v362_v29 }
  0xde   : > { %v509_v62 = vpop.permute.xlu0 %508  ;;  %v439_v15 = vadd.f32 %v435_v34, %v398_v63 }
  0xdf   : > { %v444_v7 = vpop.permute.xlu1 %443  ;;  %v513_v8 = vmul.f32 %v509_v62, %v501_v60  ;;  %v514_v24 = vmul.f32 %v509_v62, %v502_v55  ;;  %v440_v12 = vadd.f32 %v436_v35, %v399_v46 }
  0xe0   : > { %v454_v14 = vsel %vm451_vm2, %v1782_v32, %v444_v7  ;;  %781 = vperm.xlu1 %1315, %v1451_v5   ;;  %v452_v48 = vsel %vm451_vm2, %v444_v7, %v1782_v32  ;;  %1326 = vset.pattern.permute.xlu0 %v1387_v31 }
  0xe1   : > { %v461_v11 = vsel %vm416_vm10, %v454_v14, 0.0  ;;  %v472_v16 = vmul.f32 %v1810_v9, %v452_v48  ;;  %1037 = vperm.xlu0 %1326, %v1456_v6  }
  0xe2   : > { %v473_v21 = vmul.f32 %v1810_v9, %v461_v11  ;;  %v524_v17 = vpop.permute.xlu0 %523 }
  0xe3   : > { %v1885_v18 = vadd.f32 %v472_v16, %v439_v15  ;;  %v446_v25 = vpop.permute.xlu1 %445 }
  0xe4   : > { %v1887_v47 = vadd.f32 %v473_v21, %v440_v12  ;;  %792 = vrot.lane.b32.xlu1 %v1436_v2, %s1377_s10 }
  0xe5   : > { %1316 = vset.pattern.permute.xlu1 %v1378_v45  ;;  %1041 = vperm.xlu0 %1326, %v1451_v5  }
  0xe6   : > { %v544_v32 = vpop.permute.xlu0 %543 }
  0xe7   : > { %v450_v39 = vpop.permute.xlu1 %449 }
  0xe8   : > { %v455_v23 = vsel %vm451_vm2, %v450_v39, %v446_v25  ;;  %796 = vrot.lane.b32.xlu1 %v1433_v1, %s1377_s10  ;;  %v453_v45 = vsel %vm451_vm2, %v446_v25, %v450_v39  ;;  %vm722_vm2 = vcmp.lt.s32.totalorder %v1575_v36, 125 }
  0xe9   : > { %993 = vrot.lane.b32.xlu0 %v1441_v3, %s1388_s19  ;;  %v463_v28 = vsel %vm416_vm10, %v455_v23, 0.0  ;;  %vm650_vm10 = vcmp.ge.s32.totalorder %v1597_v44, 2 }
  0xea   : > { %v561_v9 = vpop.permute.xlu0 %560  ;;  %1328 = vset.pattern.permute.xlu0 %v1389_v27 }
  0xeb   : > { %v470_v38 = vpop.permute.xlu1 %469 }
  0xec   : > { %v474_v41 = vmul.f32 %v470_v38, %v453_v45  ;;  %v475_v30 = vmul.f32 %v470_v38, %v463_v28  ;;  %816 = vperm.xlu1 %1316, %v1456_v6  }
  0xed   : > { %1067 = vperm.xlu0 %1328, %v1451_v5  }
  0xee   : > { %v478_v49 = vadd.f32 %v474_v41, %v1820_v52  ;;  %v479_v50 = vadd.f32 %v475_v30, %v1822_v56  ;;  %v565_v37 = vpop.permute.xlu0 %564 }
  0xef   : > { %v481_v59 = vpop.permute.xlu1 %480  ;;  %v568_v10 = vsel %vm566_vm1, %v561_v9, %v565_v37  ;;  %v570_v19 = vsel %vm566_vm1, %v565_v37, %v561_v9 }
  0xf0   : > { %v1918_v54 = vadd.f32 %v513_v8, %v478_v49  ;;  %v1920_v42 = vadd.f32 %v514_v24, %v479_v50  ;;  %831 = vrot.lane.b32.xlu1 %v1436_v2, %s1379_s11  ;;  %v579_v52 = vsel %vm571_vm3, %v570_v19, 0.0  ;;  %v580_v56 = vsel %vm572_vm5, %v568_v10, 0.0 }
  0xf1   : > { %1319 = vset.pattern.permute.xlu1 %v1380_v58  ;;  %1330 = vset.pattern.permute.xlu0 %v1346_v0  ;;  %v1390_v19 = vmov 19  }
  0xf2   : > { %v587_v53 = vpop.permute.xlu0 %586  ;;  %1106 = vperm.xlu0 %1330, %v182_v20  }
  0xf3   : > { %v485_v26 = vpop.permute.xlu1 %484  ;;  %v591_v29 = vmul.f32 %v587_v53, %v579_v52  ;;  %v592_v57 = vmul.f32 %v587_v53, %v580_v56 }
  0xf4   : > { %833 = vrot.lane.b32.xlu1 %v1444_v4, %s1379_s11  ;;  %v489_v60 = vsel %vm488_vm15, %v481_v59, %v485_v26  ;;  %v491_v55 = vsel %vm488_vm15, %v485_v26, %v481_v59  ;;  %vm688_vm15 = vcmp.lt.s32.totalorder %v1594_v43, 14 }
  0xf5   : > { %v499_v58 = vsel %vm284_vm4, %v489_v60, 0.0  ;;  %v500_v35 = vsel %vm1849_vm0, %v491_v55, 0.0  ;;  %vm644_vm4 = vcmp.lt.s32.totalorder %v1575_v36, 2  ;;  %vm689_vm0 = vcmp.lt.s32.totalorder %v1597_v44, 14 }
  0xf6   : > { %v1936_v61 = vpop.permute.xlu0 %601 }
  0xf7   : > { %v505_v34 = vpop.permute.xlu1 %504 }
  0xf8   : > { %837 = vrot.lane.b32.xlu1 %v1441_v3, %s1379_s11  ;;  %v511_v62 = vmul.f32 %v505_v34, %v499_v58  ;;  %v512_v63 = vmul.f32 %v505_v34, %v500_v35 }
  0xfa   : > { %v1947_v7 = vpop.permute.xlu0 %621  ;;  %v515_v14 = vadd.f32 %v511_v62, %v1885_v18  ;;  %v516_v48 = vadd.f32 %v512_v63, %v1887_v47 }
  0xfb   : > { %v520_v8 = vpop.permute.xlu1 %519 }
  0xfc   : > { %v528_v3 = vsel %vm527_vm6, %v520_v8, %v524_v17  ;;  %v530_v24 = vsel %vm527_vm6, %v524_v17, %v520_v8  ;;  %859 = vperm.xlu1 %1319, %v1451_v5  }
  0xfd   : > { %v538_v51 = vsel %vm532_vm7, %v530_v24, 0.0  ;;  %v539_v46 = vsel %vm533_vm8, %v528_v3, 0.0 }
  0xfe   : > { %v550_v31 = vmul.f32 %v544_v32, %v538_v51  ;;  %v551_v15 = vmul.f32 %v544_v32, %v539_v46  ;;  %v639_v11 = vpop.permute.xlu0 %638 }
  0xff   : > { %v522_v16 = vpop.permute.xlu1 %521 }
 0x100   : > { %870 = vrot.lane.b32.xlu1 %v1436_v2, %s1381_s15  ;;  %v554_v12 = vadd.f32 %v550_v31, %v515_v14  ;;  %v555_v21 = vadd.f32 %v551_v15, %v516_v48 }
 0x101   : > { %1320 = vset.pattern.permute.xlu1 %v1382_v13 }
 0x102   : > { %v643_v17 = vpop.permute.xlu0 %642 }
 0x103   : > { %v526_v18 = vpop.permute.xlu1 %525  ;;  %v646_v25 = vsel %vm644_vm4, %v639_v11, %v643_v17  ;;  %v648_v47 = vsel %vm644_vm4, %v643_v17, %v639_v11 }
 0x104   : > { %v529_v32 = vsel %vm527_vm6, %v522_v16, %v526_v18  ;;  %v531_v39 = vsel %vm527_vm6, %v526_v18, %v522_v16  ;;  %874 = vrot.lane.b32.xlu1 %v1433_v1, %s1381_s15  ;;  %v657_v13 = vsel %vm649_vm9, %v648_v47, 0.0  ;;  %v658_v23 = vsel %vm650_vm10, %v646_v25, 0.0 }
 0x105   : > { %v540_v45 = vsel %vm532_vm7, %v531_v39, 0.0  ;;  %v541_v28 = vsel %vm533_vm8, %v529_v32, 0.0  ;;  %v1332_v32 = vld [vmem:[%s1430_s17 + $0x38] sm:$0xff]  ;;  %vm766_vm6 = vcmp.lt.s32.totalorder %v1594_v43, 12  ;;  %vm767_vm7 = vcmp.lt.s32.totalorder %v1597_v44, 12 }
 0x106   : > { %v665_v9 = vpop.permute.xlu0 %664  ;;  %vm800_vm8 = vcmp.lt.s32.totalorder %v1575_v36, 123 }
 0x107   : > { %v548_v38 = vpop.permute.xlu1 %547  ;;  %v669_v41 = vmul.f32 %v665_v9, %v657_v13  ;;  %v670_v30 = vmul.f32 %v665_v9, %v658_v23  ;;  %v1333_v9 = vld [vmem:[%s1430_s17 + $0x20] sm:$0xff] }
 0x108   : > { %v552_v49 = vmul.f32 %v548_v38, %v540_v45  ;;  %v553_v50 = vmul.f32 %v548_v38, %v541_v28  ;;  %894 = vperm.xlu1 %1320, %v1456_v6  }
 0x10a   : > { %v556_v37 = vadd.f32 %v552_v49, %v1918_v54  ;;  %v557_v59 = vadd.f32 %v553_v50, %v1920_v42 }
 0x10b   : > { %v559_v10 = vpop.permute.xlu1 %558 }
 0x10c   : > { %1322 = vset.pattern.permute.xlu1 %v1390_v19  ;;  %v595_v20 = vadd.f32 %v591_v29, %v556_v37  ;;  %v596_v52 = vadd.f32 %v592_v57, %v557_v59  ;;  %v1334_v59 = vld [vmem:[%s1430_s17 + $0x28] sm:$0xff] }
 0x10d   : > { %933 = vperm.xlu1 %1322, %v1456_v6  }
 0x10f   : > { %v563_v56 = vpop.permute.xlu1 %562 }
 0x110   : > { %v567_v53 = vsel %vm566_vm1, %v559_v10, %v563_v56  ;;  %v569_v26 = vsel %vm566_vm1, %v563_v56, %v559_v10  ;;  %vm727_vm1 = vcmp.lt.s32.totalorder %v1594_v43, 13 }
 0x111   : > { %937 = vperm.xlu1 %1322, %v1451_v5   ;;  %v577_v54 = vsel %vm571_vm3, %v569_v26, 0.0  ;;  %v578_v42 = vsel %vm572_vm5, %v567_v53, 0.0  ;;  %v1335_v26 = vld [vmem:[%s1430_s17 + $0x30] sm:$0xff]  ;;  %vm728_vm3 = vcmp.lt.s32.totalorder %v1597_v44, 13  ;;  %vm761_vm5 = vcmp.lt.s32.totalorder %v1575_v36, 124 }
 0x113   : > { %v583_v60 = vpop.permute.xlu1 %582 }
 0x114   : > { %v589_v29 = vmul.f32 %v583_v60, %v577_v54  ;;  %v590_v57 = vmul.f32 %v583_v60, %v578_v42 }
 0x115   : > { %909 = vrot.lane.b32.xlu1 %v1436_v2, %s1384_s16 }
 0x116   : > { %v593_v55 = vadd.f32 %v589_v29, %v554_v12  ;;  %v594_v34 = vadd.f32 %v590_v57, %v555_v21  ;;  %1324 = vset.pattern.permute.xlu1 %v1385_v22  ;;  %v680_v12 = vpop.permute.xlu0 %679 }
 0x117   : > { %v598_v5 = vpop.permute.xlu1 %597 }
 0x118   : > { %v606_v58 = vsel %vm605_vm11, %v598_v5, %v1936_v61  ;;  %v608_v35 = vsel %vm605_vm11, %v1936_v61, %v598_v5  ;;  %v1336_v5 = vld [vmem:[%s2298_s1] sm:$0xff] }
 0x119   : > { %v616_v2 = vsel %vm610_vm12, %v608_v35, 0.0  ;;  %v617_v62 = vsel %vm611_vm13, %v606_v58, 0.0  ;;  %913 = vrot.lane.b32.xlu1 %v1433_v1, %s1384_s16 }
 0x11a   : > { %v628_v22 = vmul.f32 %v1947_v7, %v616_v2  ;;  %v629_v63 = vmul.f32 %v1947_v7, %v617_v62 }
 0x11b   : > { %v600_v8 = vpop.permute.xlu1 %599 }
 0x11c   : > { %v632_v3 = vadd.f32 %v628_v22, %v593_v55  ;;  %v633_v24 = vadd.f32 %v629_v63, %v594_v34 }
 0x11d   : > { %911 = vrot.lane.b32.xlu1 %v1444_v4, %s1384_s16 }
 0x11f   : > { %v604_v61 = vpop.permute.xlu1 %603 }
 0x120   : > { %v607_v51 = vsel %vm605_vm11, %v600_v8, %v604_v61  ;;  %v609_v46 = vsel %vm605_vm11, %v604_v61, %v600_v8  ;;  %vm844_vm11 = vcmp.ge.s32.totalorder %v1575_v36, 80 }
 0x121   : > { %1011 = vperm.xlu1 %1324, %v1456_v6   ;;  %v618_v14 = vsel %vm610_vm12, %v609_v46, 0.0  ;;  %v619_v7 = vsel %vm611_vm13, %v607_v51, 0.0  ;;  %vm878_vm12 = vcmp.lt.s32.totalorder %v1575_v36, 64  ;;  %vm917_vm13 = vcmp.lt.s32.totalorder %v1575_v36, 48 }
 0x123   : > { %v626_v48 = vpop.permute.xlu1 %625 }
 0x124   : > { %v630_v31 = vmul.f32 %v626_v48, %v618_v14  ;;  %v631_v15 = vmul.f32 %v626_v48, %v619_v7  ;;  %v1337_v48 = vld [vmem:[%s2298_s1 + $0x8] sm:$0xff] }
 0x125   : > { %952 = vrot.lane.b32.xlu1 %v1433_v1, %s1386_s18  ;;  %v700_v1 = vpop.permute.xlu0 %699 }
 0x126   : > { %v634_v11 = vadd.f32 %v630_v31, %v595_v20  ;;  %v635_v16 = vadd.f32 %v631_v15, %v596_v52  ;;  %1327 = vset.pattern.permute.xlu1 %v1389_v27 }
 0x127   : > { %v637_v6 = vpop.permute.xlu1 %636 }
 0x128   : > { %v673_v21 = vadd.f32 %v669_v41, %v634_v11  ;;  %v674_v17 = vadd.f32 %v670_v30, %v635_v16 }
 0x129   : > { %950 = vrot.lane.b32.xlu1 %v1444_v4, %s1386_s18  ;;  %v717_v38 = vpop.permute.xlu0 %716 }
 0x12b   : > { %v641_v18 = vpop.permute.xlu1 %640 }
 0x12c   : > { %v645_v25 = vsel %vm644_vm4, %v637_v6, %v641_v18  ;;  %v647_v47 = vsel %vm644_vm4, %v641_v18, %v637_v6  ;;  %vm805_vm4 = vcmp.lt.s32.totalorder %v1594_v43, 11 }
 0x12d   : > { %954 = vrot.lane.b32.xlu1 %v1332_v32, %s1386_s18  ;;  %v655_v27 = vsel %vm649_vm9, %v647_v47, 0.0  ;;  %v656_v39 = vsel %vm650_vm10, %v645_v25, 0.0  ;;  %v721_v53 = vpop.permute.xlu0 %720  ;;  %vm806_vm9 = vcmp.lt.s32.totalorder %v1597_v44, 11  ;;  %vm839_vm10 = vcmp.lt.s32.totalorder %v1575_v36, 80 }
 0x12e   : > { %v724_v54 = vsel %vm722_vm2, %v717_v38, %v721_v53  ;;  %v726_v42 = vsel %vm722_vm2, %v721_v53, %v717_v38 }
 0x12f   : > { %v661_v13 = vpop.permute.xlu1 %660  ;;  %v735_v55 = vsel %vm727_vm1, %v724_v54, 0.0  ;;  %v736_v34 = vsel %vm728_vm3, %v726_v42, 0.0 }
 0x130   : > { %v667_v4 = vmul.f32 %v661_v13, %v655_v27  ;;  %v668_v23 = vmul.f32 %v661_v13, %v656_v39 }
 0x131   : > { %987 = vrot.lane.b32.xlu1 %v1333_v9, %s1388_s19  ;;  %v743_v58 = vpop.permute.xlu0 %742 }
 0x132   : > { %v671_v45 = vadd.f32 %v667_v4, %v632_v3  ;;  %v672_v28 = vadd.f32 %v668_v23, %v633_v24  ;;  %v747_v22 = vmul.f32 %v743_v58, %v735_v55  ;;  %v748_v63 = vmul.f32 %v743_v58, %v736_v34 }
 0x133   : > { %v676_v41 = vpop.permute.xlu1 %675  ;;  %v1391_v24 = vmov 24  }
 0x134   : > { %v684_v30 = vsel %vm683_vm14, %v676_v41, %v680_v12  ;;  %v686_v49 = vsel %vm683_vm14, %v680_v12, %v676_v41  ;;  %v183_v12 = vld [vmem:[%s2299_s2 + $0x8] sm:$0xff] }
 0x135   : > { %v694_v50 = vsel %vm688_vm15, %v684_v30, 0.0  ;;  %v695_v37 = vsel %vm689_vm0, %v686_v49, 0.0  ;;  %991 = vrot.lane.b32.xlu1 %v1334_v59, %s1388_s19  ;;  %v758_v15 = vpop.permute.xlu0 %757 }
 0x136   : > { %v706_v10 = vmul.f32 %v700_v1, %v694_v50  ;;  %v707_v19 = vmul.f32 %v700_v1, %v695_v37 }
 0x137   : > { %v678_v20 = vpop.permute.xlu1 %677 }
 0x138   : > { %v710_v52 = vadd.f32 %v706_v10, %v671_v45  ;;  %v711_v56 = vadd.f32 %v707_v19, %v672_v28 }
 0x139   : > { %989 = vrot.lane.b32.xlu1 %v1335_v26, %s1388_s19  ;;  %v778_v47 = vpop.permute.xlu0 %777 }
 0x13b   : > { %v682_v60 = vpop.permute.xlu1 %681 }
 0x13c   : > { %v685_v29 = vsel %vm683_vm14, %v678_v20, %v682_v60  ;;  %v687_v57 = vsel %vm683_vm14, %v682_v60, %v678_v20  ;;  %vm883_vm14 = vcmp.ge.s32.totalorder %v1575_v36, 64 }
 0x13d   : > { %1063 = vperm.xlu1 %1327, %v1336_v5   ;;  %v696_v35 = vsel %vm688_vm15, %v685_v29, 0.0  ;;  %v697_v2 = vsel %vm689_vm0, %v687_v57, 0.0  ;;  %v795_v28 = vpop.permute.xlu0 %794  ;;  %vm956_vm15 = vcmp.lt.s32.totalorder %v1575_v36, 32  ;;  %vm922_vm0 = vcmp.ge.s32.totalorder %v1575_v36, 48 }
 0x13f   : > { %v704_v62 = vpop.permute.xlu1 %703 }
 0x140   : > { %v708_v8 = vmul.f32 %v704_v62, %v696_v35  ;;  %v709_v3 = vmul.f32 %v704_v62, %v697_v2 }
 0x141   : > { %1329 = vset.pattern.permute.xlu1 %v1391_v24  ;;  %v799_v37 = vpop.permute.xlu0 %798 }
 0x142   : > { %v712_v61 = vadd.f32 %v708_v8, %v673_v21  ;;  %v713_v51 = vadd.f32 %v709_v3, %v674_v17  ;;  %1089 = vperm.xlu1 %1329, %v1336_v5  }
 0x143   : > { %v715_v46 = vpop.permute.xlu1 %714 }
 0x144   : > { %v751_v14 = vadd.f32 %v747_v22, %v712_v61  ;;  %v752_v7 = vadd.f32 %v748_v63, %v713_v51  ;;  %v802_v51 = vsel %vm800_vm8, %v795_v28, %v799_v37 }
 0x145   : > { %v821_v54 = vpop.permute.xlu0 %820 }
 0x146   : > { %1093 = vperm.xlu1 %1329, %v1337_v48  }
 0x147   : > { %v719_v31 = vpop.permute.xlu1 %718 }
 0x148   : > { %v723_v11 = vsel %vm722_vm2, %v715_v46, %v719_v31  ;;  %v725_v16 = vsel %vm722_vm2, %v719_v31, %v715_v46  ;;  %v804_v46 = vsel %vm800_vm8, %v799_v37, %v795_v28  ;;  %vm961_vm2 = vcmp.ge.s32.totalorder %v1575_v36, 32 }
 0x149   : > { %v733_v6 = vsel %vm727_vm1, %v723_v11, 0.0  ;;  %v734_v21 = vsel %vm728_vm3, %v725_v16, 0.0  ;;  %v836_v57 = vpop.permute.xlu0 %835  ;;  %v814_v11 = vsel %vm806_vm9, %v804_v46, 0.0  ;;  %vm1027_vm1 = vcmp.lt.s32.totalorder %v1587_v40, 208 }
 0x14a   : > { %1331 = vset.pattern.permute.xlu1 %v1346_v0  ;;  %vm995_vm3 = vcmp.lt.s32.totalorder %v1575_v36, 96 }
 0x14b   : > { %1111 = vperm.xlu1 %1331, %v183_v12   ;;  %v739_v17 = vpop.permute.xlu1 %738 }
 0x14c   : > { %v745_v18 = vmul.f32 %v739_v17, %v733_v6  ;;  %v746_v25 = vmul.f32 %v739_v17, %v734_v21  ;;  %v826_v6 = vmul.f32 %v821_v54, %v814_v11 }
 0x14d   : > { %v856_v63 = vpop.permute.xlu0 %855 }
 0x14e   : > { %v749_v1 = vadd.f32 %v745_v18, %v710_v52  ;;  %v750_v32 = vadd.f32 %v746_v25, %v711_v56 }
 0x14f   : > { %v754_v0 = vpop.permute.xlu1 %753 }
 0x150   : > { %v762_v27 = vsel %vm761_vm5, %v754_v0, %v758_v15  ;;  %v764_v39 = vsel %vm761_vm5, %v758_v15, %v754_v0  ;;  %v813_v15 = vsel %vm805_vm4, %v802_v51, 0.0 }
 0x151   : > { %v772_v13 = vsel %vm766_vm6, %v762_v27, 0.0  ;;  %v773_v4 = vsel %vm767_vm7, %v764_v39, 0.0  ;;  %v825_v12 = vmul.f32 %v821_v54, %v813_v15  ;;  %v873_v39 = vpop.permute.xlu0 %872 }
 0x152   : > { %v784_v23 = vmul.f32 %v778_v47, %v772_v13  ;;  %v785_v9 = vmul.f32 %v778_v47, %v773_v4 }
 0x153   : > { %v756_v45 = vpop.permute.xlu1 %755 }
 0x154   : > { %v788_v38 = vadd.f32 %v784_v23, %v749_v1  ;;  %v789_v41 = vadd.f32 %v785_v9, %v750_v32 }
 0x155   : > { %v877_v4 = vpop.permute.xlu0 %876 }
 0x157   : > { %v760_v30 = vpop.permute.xlu1 %759 }
 0x158   : > { %v763_v49 = vsel %vm761_vm5, %v756_v45, %v760_v30  ;;  %v765_v50 = vsel %vm761_vm5, %v760_v30, %v756_v45  ;;  %vm1001_vm5 = vcmp.lt.s32.totalorder %v1587_v40, 224 }
 0x159   : > { %v774_v59 = vsel %vm766_vm6, %v763_v49, 0.0  ;;  %v775_v10 = vsel %vm767_vm7, %v765_v50, 0.0  ;;  %v899_v9 = vpop.permute.xlu0 %898  ;;  %vm1053_vm6 = vcmp.lt.s32.totalorder %v1587_v40, 192  ;;  %vm1079_vm7 = vcmp.lt.s32.totalorder %v1587_v40, 176 }
 0x15b   : > { %v782_v19 = vpop.permute.xlu1 %781 }
 0x15c   : > { %v786_v20 = vmul.f32 %v782_v19, %v774_v59  ;;  %v787_v52 = vmul.f32 %v782_v19, %v775_v10 }
 0x15e   : > { %v790_v56 = vadd.f32 %v786_v20, %v751_v14  ;;  %v791_v53 = vadd.f32 %v787_v52, %v752_v7  ;;  %v2179_v52 = vsel %vm878_vm12, %v877_v4, %v873_v39 }
 0x15f   : > { %v793_v26 = vpop.permute.xlu1 %792 }
 0x160   : > { %v829_v25 = vadd.f32 %v825_v12, %v790_v56  ;;  %v830_v47 = vadd.f32 %v826_v6, %v791_v53 }
 0x163   : > { %v797_v42 = vpop.permute.xlu1 %796 }
 0x164   : > { %v801_v60 = vsel %vm800_vm8, %v793_v26, %v797_v42  ;;  %v803_v29 = vsel %vm800_vm8, %v797_v42, %v793_v26 }
 0x165   : > { %v811_v55 = vsel %vm805_vm4, %v801_v60, 0.0  ;;  %v812_v34 = vsel %vm806_vm9, %v803_v29, 0.0  ;;  %v2197_v60 = vsel %vm878_vm12, %v873_v39, %v877_v4  ;;  %v891_v29 = vsel %vm883_vm14, %v2179_v52, 0.0 }
 0x167   : > { %v817_v5 = vpop.permute.xlu1 %816 }
 0x168   : > { %v823_v58 = vmul.f32 %v817_v5, %v811_v55  ;;  %v824_v35 = vmul.f32 %v817_v5, %v812_v34 }
 0x16a   : > { %v827_v2 = vadd.f32 %v823_v58, %v788_v38  ;;  %v828_v62 = vadd.f32 %v824_v35, %v789_v41  ;;  %v973_v38 = vpop.permute.xlu0 %972 }
 0x16b   : > { %v832_v22 = vpop.permute.xlu1 %831 }
 0x16c   : > { %v2131_v8 = vsel %vm839_vm10, %v832_v22, %v836_v57  ;;  %v2135_v3 = vsel %vm839_vm10, %v836_v57, %v832_v22  ;;  %v903_v22 = vmul.f32 %v899_v9, %v891_v29 }
 0x16d   : > { %v850_v24 = vsel %vm844_vm11, %v2135_v3, 0.0  ;;  %v863_v61 = vmul.f32 %v856_v63, %v2131_v8  ;;  %v1033_v11 = vsel %vm1027_vm1, %v2135_v3, 0.0 }
 0x16e   : > { %v862_v14 = vmul.f32 %v856_v63, %v850_v24  ;;  %v2169_v30 = vpop.permute.xlu0 %976 }
 0x16f   : > { %v2145_v7 = vadd.f32 %v863_v61, %v828_v62  ;;  %v834_v48 = vpop.permute.xlu1 %833 }
 0x170   : > { %v2147_v31 = vadd.f32 %v862_v14, %v827_v2  ;;  %v904_v14 = vmul.f32 %v899_v9, %v2197_v60 }
 0x172   : > { %v916_v37 = vpop.permute.xlu0 %915 }
 0x173   : > { %v838_v16 = vpop.permute.xlu1 %837 }
 0x174   : > { %v2155_v21 = vsel %vm839_vm10, %v838_v16, %v834_v48  ;;  %v2159_v17 = vsel %vm839_vm10, %v834_v48, %v838_v16 }
 0x175   : > { %v852_v18 = vsel %vm844_vm11, %v2155_v21, 0.0 }
 0x176   : > { %v949_v10 = vpop.permute.xlu0 %948 }
 0x177   : > { %v860_v43 = vpop.permute.xlu1 %859 }
 0x178   : > { %v864_v44 = vmul.f32 %v860_v43, %v852_v18  ;;  %v865_v1 = vmul.f32 %v860_v43, %v2159_v17 }
 0x17a   : > { %v2165_v32 = vadd.f32 %v864_v44, %v829_v25  ;;  %v2167_v0 = vadd.f32 %v865_v1, %v830_v47  ;;  %v2181_v56 = vpop.permute.xlu0 %1015 }
 0x17b   : > { %v871_v27 = vpop.permute.xlu1 %870 }
 0x17c   : > { %v907_v3 = vadd.f32 %v903_v22, %v2165_v32 }
 0x17e   : > { %v1038_v63 = vpop.permute.xlu0 %1037 }
 0x17f   : > { %v875_v13 = vpop.permute.xlu1 %874  ;;  %v1044_v18 = vmul.f32 %v1038_v63, %v2131_v8 }
 0x180   : > { %v2185_v53 = vsel %vm878_vm12, %v875_v13, %v871_v27  ;;  %v2206_v34 = vsel %vm878_vm12, %v871_v27, %v875_v13 }
 0x181   : > { %v889_v57 = vsel %vm883_vm14, %v2185_v53, 0.0  ;;  %v1059_v36 = vsel %vm1053_vm6, %v2185_v53, 0.0 }
 0x182   : > { %v1042_v44 = vpop.permute.xlu0 %1041 }
 0x183   : > { %v895_v23 = vpop.permute.xlu1 %894  ;;  %v1046_v22 = vmul.f32 %v1042_v44, %v2159_v17  ;;  %v1061_v17 = vsel %vm1053_vm6, %v2179_v52, 0.0 }
 0x184   : > { %v901_v5 = vmul.f32 %v895_v23, %v889_v57  ;;  %v902_v2 = vmul.f32 %v895_v23, %v2206_v34 }
 0x186   : > { %v905_v16 = vadd.f32 %v901_v5, %v2147_v31  ;;  %v906_v43 = vadd.f32 %v902_v2, %v2145_v7 }
 0x188   : > { %v934_v45 = vpop.permute.xlu1 %933 }
 0x18c   : > { %v938_v28 = vpop.permute.xlu1 %937 }
 0x190   : > { %v910_v41 = vpop.permute.xlu1 %909 }
 0x194   : > { %v914_v49 = vpop.permute.xlu1 %913 }
 0x195   : > { %v2190_v26 = vsel %vm917_vm13, %v914_v49, %v910_v41  ;;  %v2210_v58 = vsel %vm917_vm13, %v910_v41, %v914_v49 }
 0x196   : > { %v928_v55 = vsel %vm922_vm0, %v2190_v26, 0.0  ;;  %v941_v48 = vmul.f32 %v934_v45, %v2210_v58 }
 0x197   : > { %v940_v24 = vmul.f32 %v934_v45, %v928_v55 }
 0x198   : > { %v912_v50 = vpop.permute.xlu1 %911  ;;  %v945_v13 = vadd.f32 %v941_v48, %v906_v43 }
 0x199   : > { %v2214_v35 = vsel %vm917_vm13, %v916_v37, %v912_v50  ;;  %v2238_v12 = vsel %vm917_vm13, %v912_v50, %v916_v37  ;;  %v944_v1 = vadd.f32 %v940_v24, %v905_v16  ;;  %v1045_v50 = vmul.f32 %v1038_v63, %v1033_v11 }
 0x19a   : > { %v930_v15 = vsel %vm922_vm0, %v2214_v35, 0.0  ;;  %v943_v4 = vmul.f32 %v938_v28, %v2238_v12  ;;  %v1035_v37 = vsel %vm1027_vm1, %v2155_v21, 0.0 }
 0x19b   : > { %v942_v31 = vmul.f32 %v938_v28, %v930_v15 }
 0x19c   : > { %v2171_v59 = vpop.permute.xlu1 %1011 }
 0x1a0   : > { %v953_v19 = vpop.permute.xlu1 %952 }
 0x1a1   : > { %v959_v54 = vsel %vm956_vm15, %v953_v19, %v949_v10  ;;  %v957_v61 = vsel %vm956_vm15, %v949_v10, %v953_v19  ;;  %v994_v10 = vpop.permute.xlu0 %993  ;;  %v946_v19 = vadd.f32 %v942_v31, %v907_v3 }
 0x1a2   : > { %v967_v62 = vsel %vm961_vm2, %v959_v54, 0.0  ;;  %v980_v25 = vmul.f32 %v973_v38, %v957_v61  ;;  %v1047_v61 = vmul.f32 %v1042_v44, %v1035_v37 }
 0x1a3   : > { %v979_v6 = vmul.f32 %v973_v38, %v967_v62  ;;  %v908_v38 = vadd.f32 %v904_v14, %v2167_v0 }
 0x1a4   : > { %v951_v20 = vpop.permute.xlu1 %950  ;;  %v984_v41 = vadd.f32 %v980_v25, %v945_v13 }
 0x1a5   : > { %v983_v23 = vadd.f32 %v979_v6, %v944_v1  ;;  %v1068_v15 = vpop.permute.xlu0 %1067 }
 0x1a6   : > { %v1072_v43 = vmul.f32 %v1068_v15, %v2197_v60  ;;  %v1073_v25 = vmul.f32 %v1068_v15, %v1061_v17 }
 0x1a8   : > { %v955_v42 = vpop.permute.xlu1 %954 }
 0x1a9   : > { %v960_v51 = vsel %vm956_vm15, %v955_v42, %v951_v20  ;;  %v958_v27 = vsel %vm956_vm15, %v951_v20, %v955_v42  ;;  %v947_v42 = vadd.f32 %v943_v4, %v908_v38  ;;  %v1107_v44 = vpop.permute.xlu0 %1106 }
 0x1aa   : > { %v969_v47 = vsel %vm961_vm2, %v960_v51, 0.0  ;;  %v982_v49 = vmul.f32 %v2169_v30, %v958_v27 }
 0x1ab   : > { %v981_v9 = vmul.f32 %v2169_v30, %v969_v47  ;;  %v1119_v47 = vshrl.u32 %v184_v33, 7 }
 0x1ac   : > { %v988_v46 = vpop.permute.xlu1 %987  ;;  %v986_v21 = vadd.f32 %v982_v49, %v947_v42 }
 0x1ad   : > { %v985_v30 = vadd.f32 %v981_v9, %v946_v19  ;;  %vm1121_vm8 = vcmp.ge.s32.totalorder %v1119_v47, 4 }
 0x1b0   : > { %v992_v39 = vpop.permute.xlu1 %991 }
 0x1b1   : > { %v996_v8 = vsel %vm995_vm3, %v988_v46, %v992_v39  ;;  %v998_v7 = vsel %vm995_vm3, %v992_v39, %v988_v46 }
 0x1b2   : > { %v1007_v32 = vsel %vm1001_vm5, %v998_v7, 0.0  ;;  %v1018_v45 = vmul.f32 %v2171_v59, %v996_v8 }
 0x1b3   : > { %v1019_v28 = vmul.f32 %v2171_v59, %v1007_v32 }
 0x1b4   : > { %v1022_v20 = vadd.f32 %v1018_v45, %v983_v23  ;;  %v990_v54 = vpop.permute.xlu1 %989 }
 0x1b5   : > { %v1023_v29 = vadd.f32 %v1019_v28, %v984_v41  ;;  %v997_v57 = vsel %vm995_vm3, %v990_v54, %v994_v10  ;;  %v999_v0 = vsel %vm995_vm3, %v994_v10, %v990_v54 }
 0x1b6   : > { %v1009_v59 = vsel %vm1001_vm5, %v999_v0, 0.0  ;;  %v1020_v55 = vmul.f32 %v2181_v56, %v997_v57  ;;  %v1048_v5 = vadd.f32 %v1044_v18, %v1022_v20 }
 0x1b7   : > { %v1021_v2 = vmul.f32 %v2181_v56, %v1009_v59  ;;  %v1049_v62 = vadd.f32 %v1045_v50, %v1023_v29  ;;  %v1085_v56 = vsel %vm1079_vm7, %v2190_v26, 0.0  ;;  %v1087_v26 = vsel %vm1079_vm7, %v2214_v35, 0.0 }
 0x1b8   : > { %v1024_v63 = vadd.f32 %v1020_v55, %v985_v30  ;;  %v1064_v24 = vpop.permute.xlu1 %1063 }
 0x1b9   : > { %v1025_v51 = vadd.f32 %v1021_v2, %v986_v21  ;;  %v1070_v46 = vmul.f32 %v1064_v24, %v2206_v34  ;;  %v1071_v14 = vmul.f32 %v1064_v24, %v1059_v36 }
 0x1ba   : > { %v1050_v48 = vadd.f32 %v1046_v22, %v1024_v63 }
 0x1bb   : > { %v1051_v11 = vadd.f32 %v1047_v61, %v1025_v51  ;;  %v1074_v6 = vadd.f32 %v1070_v46, %v1048_v5  ;;  %v1075_v18 = vadd.f32 %v1071_v14, %v1049_v62 }
 0x1bc   : > { %v1076_v31 = vadd.f32 %v1072_v43, %v1050_v48 }
 0x1bd   : > { %v1090_v16 = vpop.permute.xlu1 %1089  ;;  %v1077_v27 = vadd.f32 %v1073_v25, %v1051_v11 }
 0x1be   : > { %v1096_v53 = vmul.f32 %v1090_v16, %v2210_v58  ;;  %v1097_v34 = vmul.f32 %v1090_v16, %v1085_v56 }
 0x1c0   : > { %v1100_v3 = vadd.f32 %v1096_v53, %v1074_v6  ;;  %v1101_v1 = vadd.f32 %v1097_v34, %v1075_v18 }
 0x1c1   : > { %v1094_v52 = vpop.permute.xlu1 %1093 }
 0x1c2   : > { %v1098_v39 = vmul.f32 %v1094_v52, %v2238_v12  ;;  %v1099_v58 = vmul.f32 %v1094_v52, %v1087_v26  ;;  %v1114_v13 = vadd.f32 %v1107_v44, %v1100_v3  ;;  %v1115_v4 = vadd.f32 %v1107_v44, %v1101_v1 }
 0x1c4   : > { %v1123_v33 = vmax.f32 %v1114_v13, 0.0  ;;  %v1124_v60 = vmax.f32 %v1115_v4, 0.0  ;;  %v1102_v8 = vadd.f32 %v1098_v39, %v1076_v31  ;;  %v1103_v7 = vadd.f32 %v1099_v58, %v1077_v27 }
 0x1c6   : > { %v1131_v23 = vsel %vm1121_vm8, %v1123_v33, %v1114_v13  ;;  %v1132_v40 = vsel %vm1121_vm8, %v1124_v60, %v1115_v4  ;;  %v1112_v35 = vpop.permute.xlu1 %1111 }
 0x1c7   : > { %1223 = vst [vmem:[%s1180_s29 + $0x20] sm:$0xff] %v1131_v23  ;;  %1224 = vst [vmem:[%s1180_s29 + $0x28] sm:$0xff] %v1132_v40  ;;  %v1116_v9 = vadd.f32 %v1112_v35, %v1102_v8  ;;  %v1117_v12 = vadd.f32 %v1112_v35, %v1103_v7 }
 0x1c9   : > { %v1125_v32 = vmax.f32 %v1116_v9, 0.0  ;;  %v1126_v45 = vmax.f32 %v1117_v12, 0.0 }
 0x1cb   : > { %1225 = vst [vmem:[%s1180_s29 + $0x30] sm:$0xff] %v1125_v32  ;;  %1226 = vst [vmem:[%s1180_s29 + $0x38] sm:$0xff] %v1126_v45 }
 0x1cc PF: > { %s13_s12 = sadd.s32 1, %s1344_s12  }
 0x1cd   : > { %p10_p4 = scmp.ge.s32.totalorder %s13_s12, 4  }
 0x1cf   :  { %12 = sbr.rel (!%p10_p4) target bundleno = 1 (0x1), region = 62 }

</bundles_post_ra>
